<compile_context>
chip_gen: v7x
topology: tpu7x:2x2x1
jax: 0.10.0
libtpu: 0.0.40
codegen_flags: <defaults>
</compile_context>

<pallas_src>
import math

import jax
import jax.numpy as jnp
from jax.experimental import pallas as pl
from jax.experimental.pallas import tpu as pltpu

HIDDEN = 400   # true hidden width of the PyTorch module
HPAD = 512     # lane-aligned padded hidden width used inside the kernel


def _round_up(a, m):
    return ((a + m - 1) // m) * m


def _t_mlp_kernel(xz_ref, w1_ref, b1_ref, w2_ref, b2_ref, w3_ref, b3_ref,
                  w4_ref, b4_ref, o_ref):
    # Layer 1: cat([x, z]) @ W1 (MXU, f32 acc), then bf16 bias + ReLU (VPU).
    h = jnp.dot(xz_ref[...], w1_ref[...], preferred_element_type=jnp.float32)
    h = jnp.maximum(h.astype(jnp.bfloat16) + b1_ref[...], 0.0)
    # Layer 2: Linear(H, H) + ReLU
    h = jnp.dot(h, w2_ref[...], preferred_element_type=jnp.float32)
    h = jnp.maximum(h.astype(jnp.bfloat16) + b2_ref[...], 0.0)
    # Layer 3: Linear(H, H) + ReLU
    h = jnp.dot(h, w3_ref[...], preferred_element_type=jnp.float32)
    h = jnp.maximum(h.astype(jnp.bfloat16) + b3_ref[...], 0.0)
    # Layer 4: Linear(H, 1) as an f32 VPU multiply + lane reduce
    # (h is bf16, w4 is f32 -> product promotes to f32).
    o_ref[...] = jnp.sum(h * w4_ref[...], axis=-1, keepdims=True) + b4_ref[...]


def _choose_tm(B, tm_max):
    """Batch tile: big enough to amortize ~0.35 us/step pipeline overhead,
    but keeping >=2 grid steps for large batches (dual-TC on v7x)."""
    Bp8 = _round_up(max(B, 1), 8)
    if Bp8 <= 256:
        return Bp8                                   # single small step
    tm = min(_round_up(tm_max, 256), _round_up(pl.cdiv(Bp8, 2), 256))
    return max(256, tm)


def t_forward(x, z, params, *, tm_max=1024):
    """Pallas implementation of T.forward(x, z) -> (B, 1)."""
    w1, b1, w2, b2, w3, b3, w4row, b4 = params
    B = x.shape[0]
    KPAD = w1.shape[0]                    # lane-padded concat width
    H = w2.shape[0]                       # padded hidden (HPAD)

    # Concat once, cast to bf16, pad features to KPAD (all cheap XLA ops).
    xz = jnp.concatenate([x, z], axis=1).astype(jnp.bfloat16)
    K = xz.shape[1]

    tm = _choose_tm(B, tm_max)
    Bp = _round_up(B, tm)
    xz = jnp.pad(xz, ((0, Bp - B), (0, KPAD - K)))
    grid = (Bp // tm,)

    const = lambda i: (0, 0)              # weights: same block every step -> VMEM-resident

    flops = 2 * Bp * (KPAD * H + 2 * H * H + H)
    bytes_accessed = (
        (w1.size + w2.size + w3.size) * 2                    # bf16 weights
        + (b1.size + b2.size + b3.size) * 2                  # bf16 biases
        + (w4row.size + b4.size) * 4                         # f32 head
        + xz.size * 2 + Bp * 4                               # bf16 in, f32 out
    )

    out = pl.pallas_call(
        _t_mlp_kernel,
        out_shape=jax.ShapeDtypeStruct((Bp, 1), jnp.float32),
        grid_spec=pltpu.PrefetchScalarGridSpec(
            num_scalar_prefetch=0,
            grid=grid,
            in_specs=[
                pl.BlockSpec((tm, KPAD), lambda i: (i, 0)),  # xz tile over batch (bf16)
                pl.BlockSpec((KPAD, H), const),              # W1 (bf16)
                pl.BlockSpec((1, H), const),                 # b1 (bf16)
                pl.BlockSpec((H, H), const),                 # W2 (bf16)
                pl.BlockSpec((1, H), const),                 # b2 (bf16)
                pl.BlockSpec((H, H), const),                 # W3 (bf16)
                pl.BlockSpec((1, H), const),                 # b3 (bf16)
                pl.BlockSpec((1, H), const),                 # w4 as a row (f32)
                pl.BlockSpec((1, 1), const),                 # b4 (f32)
            ],
            out_specs=pl.BlockSpec((tm, 1), lambda i: (i, 0)),
        ),
        compiler_params=pltpu.CompilerParams(
            dimension_semantics=("parallel",),               # megacore sharding on v7x
            vmem_limit_bytes=32 * 1024 * 1024),
        cost_estimate=pl.CostEstimate(flops=flops, transcendentals=0,
                                      bytes_accessed=bytes_accessed),
    )(xz, w1, b1, w2, b2, w3, b3, w4row, b4)
    return out[:B]


def init_params(key, x_dim, z_dim, hidden=HIDDEN, hpad=HPAD):
    """Deterministic init mimicking PyTorch nn.Linear defaults
    (uniform(-1/sqrt(fan_in), 1/sqrt(fan_in)) for weight and bias).
    Returns (kernel_params, ref_params): kernel params are bf16 / zero-padded;
    ref params are the true f32 unpadded weights."""
    def linear(k, fan_in, fan_out):
        kw, kb = jax.random.split(k)
        bound = 1.0 / math.sqrt(fan_in)
        w = jax.random.uniform(kw, (fan_in, fan_out), jnp.float32, -bound, bound)
        b = jax.random.uniform(kb, (fan_out,), jnp.float32, -bound, bound)
        return w, b

    k1, k2, k3, k4 = jax.random.split(key, 4)
    in_dim = x_dim + z_dim
    w1, b1 = linear(k1, in_dim, hidden)
    w2, b2 = linear(k2, hidden, hidden)
    w3, b3 = linear(k3, hidden, hidden)
    w4, b4 = linear(k4, hidden, 1)
    ref_params = (w1, b1, w2, b2, w3, b3, w4, b4)

    kpad = _round_up(in_dim, 128)         # lane-aligned concat width
    p = hpad - hidden
    # Padding invariant: padded cols of each layer have zero weight + zero bias
    # (ReLU(0)=0) and padded rows of the following layer (and of w4) are zero,
    # so the padding is numerically inert.
    w1p = jnp.pad(w1, ((0, kpad - in_dim), (0, p))).astype(jnp.bfloat16)
    b1p = jnp.pad(b1, (0, p)).reshape(1, hpad).astype(jnp.bfloat16)
    w2p = jnp.pad(w2, ((0, p), (0, p))).astype(jnp.bfloat16)
    b2p = jnp.pad(b2, (0, p)).reshape(1, hpad).astype(jnp.bfloat16)
    w3p = jnp.pad(w3, ((0, p), (0, p))).astype(jnp.bfloat16)
    b3p = jnp.pad(b3, (0, p)).reshape(1, hpad).astype(jnp.bfloat16)
    w4row = jnp.pad(w4[:, 0], (0, p)).reshape(1, hpad)     # f32 row for VPU reduce
    b4p = b4.reshape(1, 1)

    kernel_params = (w1p, b1p, w2p, b2p, w3p, b3p, w4row, b4p)
    return kernel_params, ref_params


def t_forward_ref(x, z, ref_params):
    """Pure-JAX f32 reference matching the PyTorch module exactly."""
    w1, b1, w2, b2, w3, b3, w4, b4 = ref_params
    xz = jnp.concatenate([x, z], axis=1)
    h = jax.nn.relu(xz @ w1 + b1)
    h = jax.nn.relu(h @ w2 + b2)
    h = jax.nn.relu(h @ w3 + b3)
    return h @ w4 + b4


if __name__ == "__main__":
    B, x_dim, z_dim = 8, 16, 32

    key = jax.random.PRNGKey(0)
    kx, kz, kp = jax.random.split(key, 3)
    x = jax.random.normal(kx, (B, x_dim), jnp.float32)
    z = jax.random.normal(kz, (B, z_dim), jnp.float32)
    kernel_params, ref_params = init_params(kp, x_dim, z_dim)

    out = jax.block_until_ready(t_forward(x, z, kernel_params))
    ref = t_forward_ref(x, z, ref_params)

    assert out.shape == (B, 1), out.shape
    # bf16 weights + bf16 bias/ReLU path -> loosened tolerance vs f32 reference.
    err = float(jnp.max(jnp.abs(out - ref)))
    assert jnp.allclose(out, ref, atol=5e-2, rtol=5e-2), err

    print("KERNEL_OK")
</pallas_src>

<mosaic_0001>
module attributes {stable_mosaic.version = 11 : i64} {
  func.func @_t_mlp_kernel(%arg0: i32, %arg1: memref<8x128xbf16, #tpu.memory_space<vmem>>, %arg2: memref<128x512xbf16, #tpu.memory_space<vmem>>, %arg3: memref<1x512xbf16, #tpu.memory_space<vmem>>, %arg4: memref<512x512xbf16, #tpu.memory_space<vmem>>, %arg5: memref<1x512xbf16, #tpu.memory_space<vmem>>, %arg6: memref<512x512xbf16, #tpu.memory_space<vmem>>, %arg7: memref<1x512xbf16, #tpu.memory_space<vmem>>, %arg8: memref<1x512xf32, #tpu.memory_space<vmem>>, %arg9: memref<1x1xf32, #tpu.memory_space<vmem>>, %arg10: memref<8x1xf32, #tpu.memory_space<vmem>>) attributes {dimension_semantics = [#tpu.dimension_semantics<parallel>], iteration_bounds = array<i64: 1>, scalar_prefetch = 0 : i64, scratch_operands = 0 : i64, tpu.core_type = #tpu.core_type<tc>, window_params = [{transform_indices = @transform_0, window_bounds = array<i64: 8, 128>}, {pipeline_mode = #tpu.pipeline_mode<synchronous>, transform_indices = @transform_1, window_bounds = array<i64: 128, 512>}, {pipeline_mode = #tpu.pipeline_mode<synchronous>, transform_indices = @transform_2, window_bounds = array<i64: 1, 512>}, {pipeline_mode = #tpu.pipeline_mode<synchronous>, transform_indices = @transform_3, window_bounds = array<i64: 512, 512>}, {pipeline_mode = #tpu.pipeline_mode<synchronous>, transform_indices = @transform_4, window_bounds = array<i64: 1, 512>}, {pipeline_mode = #tpu.pipeline_mode<synchronous>, transform_indices = @transform_5, window_bounds = array<i64: 512, 512>}, {pipeline_mode = #tpu.pipeline_mode<synchronous>, transform_indices = @transform_6, window_bounds = array<i64: 1, 512>}, {pipeline_mode = #tpu.pipeline_mode<synchronous>, transform_indices = @transform_7, window_bounds = array<i64: 1, 512>}, {pipeline_mode = #tpu.pipeline_mode<synchronous>, transform_indices = @transform_8, window_bounds = array<i64: 1, 1>}, {transform_indices = @transform_9, window_bounds = array<i64: 8, 1>}]} {
    %c0 = arith.constant 0 : index
    %c0_0 = arith.constant 0 : index
    %0 = vector.load %arg1[%c0, %c0_0] : memref<8x128xbf16, #tpu.memory_space<vmem>>, vector<8x128xbf16>
    %c0_1 = arith.constant 0 : index
    %c0_2 = arith.constant 0 : index
    %1 = vector.load %arg2[%c0_1, %c0_2] : memref<128x512xbf16, #tpu.memory_space<vmem>>, vector<128x512xbf16>
    %cst = arith.constant dense<0.000000e+00> : vector<8x512xf32>
    %2 = tpu.matmul %0, %1, %cst {dimension_numbers = #tpu.dot_dimension_numbers<[1], [0], [0], [1], [0, 0, 1, 1], [], []>} : vector<8x128xbf16>, vector<128x512xbf16>, vector<8x512xf32> -> vector<8x512xf32>
    %3 = arith.truncf %2 : vector<8x512xf32> to vector<8x512xbf16>
    %c0_3 = arith.constant 0 : index
    %c0_4 = arith.constant 0 : index
    %4 = vector.load %arg3[%c0_3, %c0_4] : memref<1x512xbf16, #tpu.memory_space<vmem>>, vector<1x512xbf16>
    %5 = vector.broadcast %4 : vector<1x512xbf16> to vector<8x512xbf16>
    %6 = arith.addf %3, %5 : vector<8x512xbf16>
    %cst_5 = arith.constant 0.000000e+00 : bf16
    %7 = vector.broadcast %cst_5 : bf16 to vector<8x512xbf16>
    %8 = arith.maximumf %6, %7 : vector<8x512xbf16>
    %c0_6 = arith.constant 0 : index
    %c0_7 = arith.constant 0 : index
    %9 = vector.load %arg4[%c0_6, %c0_7] : memref<512x512xbf16, #tpu.memory_space<vmem>>, vector<512x512xbf16>
    %cst_8 = arith.constant dense<0.000000e+00> : vector<8x512xf32>
    %10 = tpu.matmul %8, %9, %cst_8 {dimension_numbers = #tpu.dot_dimension_numbers<[1], [0], [0], [1], [0, 0, 1, 1], [], []>} : vector<8x512xbf16>, vector<512x512xbf16>, vector<8x512xf32> -> vector<8x512xf32>
    %11 = arith.truncf %10 : vector<8x512xf32> to vector<8x512xbf16>
    %c0_9 = arith.constant 0 : index
    %c0_10 = arith.constant 0 : index
    %12 = vector.load %arg5[%c0_9, %c0_10] : memref<1x512xbf16, #tpu.memory_space<vmem>>, vector<1x512xbf16>
    %13 = vector.broadcast %12 : vector<1x512xbf16> to vector<8x512xbf16>
    %14 = arith.addf %11, %13 : vector<8x512xbf16>
    %cst_11 = arith.constant 0.000000e+00 : bf16
    %15 = vector.broadcast %cst_11 : bf16 to vector<8x512xbf16>
    %16 = arith.maximumf %14, %15 : vector<8x512xbf16>
    %c0_12 = arith.constant 0 : index
    %c0_13 = arith.constant 0 : index
    %17 = vector.load %arg6[%c0_12, %c0_13] : memref<512x512xbf16, #tpu.memory_space<vmem>>, vector<512x512xbf16>
    %cst_14 = arith.constant dense<0.000000e+00> : vector<8x512xf32>
    %18 = tpu.matmul %16, %17, %cst_14 {dimension_numbers = #tpu.dot_dimension_numbers<[1], [0], [0], [1], [0, 0, 1, 1], [], []>} : vector<8x512xbf16>, vector<512x512xbf16>, vector<8x512xf32> -> vector<8x512xf32>
    %19 = arith.truncf %18 : vector<8x512xf32> to vector<8x512xbf16>
    %c0_15 = arith.constant 0 : index
    %c0_16 = arith.constant 0 : index
    %20 = vector.load %arg7[%c0_15, %c0_16] : memref<1x512xbf16, #tpu.memory_space<vmem>>, vector<1x512xbf16>
    %21 = vector.broadcast %20 : vector<1x512xbf16> to vector<8x512xbf16>
    %22 = arith.addf %19, %21 : vector<8x512xbf16>
    %cst_17 = arith.constant 0.000000e+00 : bf16
    %23 = vector.broadcast %cst_17 : bf16 to vector<8x512xbf16>
    %24 = arith.maximumf %22, %23 : vector<8x512xbf16>
    %c0_18 = arith.constant 0 : index
    %c0_19 = arith.constant 0 : index
    %25 = vector.load %arg8[%c0_18, %c0_19] : memref<1x512xf32, #tpu.memory_space<vmem>>, vector<1x512xf32>
    %26 = arith.extf %24 : vector<8x512xbf16> to vector<8x512xf32>
    %27 = vector.broadcast %25 : vector<1x512xf32> to vector<8x512xf32>
    %28 = arith.mulf %26, %27 : vector<8x512xf32>
    %cst_20 = arith.constant dense<0.000000e+00> : vector<8xf32>
    %29 = vector.multi_reduction <add>, %28, %cst_20 [1] : vector<8x512xf32> to vector<8xf32>
    %30 = vector.shape_cast %29 : vector<8xf32> to vector<8x1xf32>
    %c0_21 = arith.constant 0 : index
    %c0_22 = arith.constant 0 : index
    %31 = vector.load %arg9[%c0_21, %c0_22] : memref<1x1xf32, #tpu.memory_space<vmem>>, vector<1x1xf32>
    %32 = vector.broadcast %31 : vector<1x1xf32> to vector<8x1xf32>
    %33 = arith.addf %30, %32 : vector<8x1xf32>
    %c0_23 = arith.constant 0 : index
    %c0_24 = arith.constant 0 : index
    %34 = vector.load %arg10[%c0_23, %c0_24] : memref<8x1xf32, #tpu.memory_space<vmem>>, vector<8x1xf32>
    tpu.vector_store %arg10[%c0_23, %c0_24], %33 {strides = array<i32>} : memref<8x1xf32, #tpu.memory_space<vmem>>, vector<8x1xf32>,
    return
  }
  func.func @transform_0(%arg0: i32) -> (i32, i32) {
    %c0_i32 = arith.constant 0 : i32
    %c0_i32_0 = arith.constant 0 : i32
    return %arg0, %c0_i32 : i32, i32
  }
  func.func @transform_1(%arg0: i32) -> (i32, i32) {
    %c0_i32 = arith.constant 0 : i32
    %c0_i32_0 = arith.constant 0 : i32
    %c0_i32_1 = arith.constant 0 : i32
    return %c0_i32, %c0_i32_0 : i32, i32
  }
  func.func @transform_2(%arg0: i32) -> (i32, i32) {
    %c0_i32 = arith.constant 0 : i32
    %c0_i32_0 = arith.constant 0 : i32
    %c0_i32_1 = arith.constant 0 : i32
    return %c0_i32, %c0_i32_0 : i32, i32
  }
  func.func @transform_3(%arg0: i32) -> (i32, i32) {
    %c0_i32 = arith.constant 0 : i32
    %c0_i32_0 = arith.constant 0 : i32
    %c0_i32_1 = arith.constant 0 : i32
    return %c0_i32, %c0_i32_0 : i32, i32
  }
  func.func @transform_4(%arg0: i32) -> (i32, i32) {
    %c0_i32 = arith.constant 0 : i32
    %c0_i32_0 = arith.constant 0 : i32
    %c0_i32_1 = arith.constant 0 : i32
    return %c0_i32, %c0_i32_0 : i32, i32
  }
  func.func @transform_5(%arg0: i32) -> (i32, i32) {
    %c0_i32 = arith.constant 0 : i32
    %c0_i32_0 = arith.constant 0 : i32
    %c0_i32_1 = arith.constant 0 : i32
    return %c0_i32, %c0_i32_0 : i32, i32
  }
  func.func @transform_6(%arg0: i32) -> (i32, i32) {
    %c0_i32 = arith.constant 0 : i32
    %c0_i32_0 = arith.constant 0 : i32
    %c0_i32_1 = arith.constant 0 : i32
    return %c0_i32, %c0_i32_0 : i32, i32
  }
  func.func @transform_7(%arg0: i32) -> (i32, i32) {
    %c0_i32 = arith.constant 0 : i32
    %c0_i32_0 = arith.constant 0 : i32
    %c0_i32_1 = arith.constant 0 : i32
    return %c0_i32, %c0_i32_0 : i32, i32
  }
  func.func @transform_8(%arg0: i32) -> (i32, i32) {
    %c0_i32 = arith.constant 0 : i32
    %c0_i32_0 = arith.constant 0 : i32
    %c0_i32_1 = arith.constant 0 : i32
    return %c0_i32, %c0_i32_0 : i32, i32
  }
  func.func @transform_9(%arg0: i32) -> (i32, i32) {
    %c0_i32 = arith.constant 0 : i32
    %c0_i32_0 = arith.constant 0 : i32
    return %arg0, %c0_i32 : i32, i32
  }
}

</mosaic_0001>

<bundles_post_ra>
// kernel: tpu_custom_call.1
= control target key start
LH: loop header
LB: loop body
LE: loop exit
PB: predicated region body
PF: predicated region fallthrough
CT: control target
= control target key end

     0   :  { %s3516_s0 = inlined_call_operand.hbm [shape: bf16[8,128], index: 0, kind: input, shape index: {}]   ;;  %s3517_s1 = inlined_call_operand.hbm [shape: bf16[128,512], index: 1, kind: input, shape index: {}]   ;;  %s3518_s2 = inlined_call_operand.vmem [shape: bf16[1,512], index: 2, kind: input, shape index: {}]   ;;  %s3519_s3 = inlined_call_operand.hbm [shape: bf16[512,512], index: 3, kind: input, shape index: {}]   ;;  %s3520_s4 = inlined_call_operand.vmem [shape: bf16[1,512], index: 4, kind: input, shape index: {}]   ;;  %s3521_s5 = inlined_call_operand.hbm [shape: bf16[512,512], index: 5, kind: input, shape index: {}]   ;;  %s3522_s6 = inlined_call_operand.vmem [shape: bf16[1,512], index: 6, kind: input, shape index: {}]   ;;  %s3523_s7 = inlined_call_operand.vmem [shape: f32[1,512], index: 7, kind: input, shape index: {}]   ;;  %s3524_s8 = inlined_call_operand.<no memory space> [shape: f32[1,1], index: 8, kind: input, shape index: {}]   ;;  %s3525_s9 = inlined_call_operand.vmem [shape: f32[8,1], index: 9, kind: output, shape index: {}]  }
   0x1   :  { %v14_v0 = vstv %s3524_s8 }
   0x2   :  { %15 = vst [vmem:[#allocation2] sm:$0x1] %v14_v0 }
   0x3   :  { %16 = vsyncpa [#allocation4], 0 }
   0x4   :  { %17 = vsyncpa [#allocation6], 0 }
   0x5   :  { %18 = vsyncpa [#allocation9], 0  ;;  %s3319_s11 = smov [#allocation5]   ;;  %s3225_s15 = scalar_lea.hbm %s3517_s1, 4096 }
   0x6   :  { %s34_s12 = sshll.u32 %s3319_s11, 4  ;;  %p3226_p0 = scmp.ne.s32.totalorder %s3517_s1, %s3225_s15  ;;  %s35_s12 = int_to_ptr.vmem [resolvable:$true] %s34_s12 }
   0x7   :  { %p3229_p1 = scmp.lt.u32.totalorder %s3225_s15, %s3517_s1 }
   0x9   :  { %p3231_p2 = pnand %p3229_p1, %p3226_p0 }
   0xb   :  { %3234 = shalt.err (!%p3231_p2)
}
   0xc   :  { %s3235_s8 = scalar_lea.vmem %s35_s12, 4096  ;;  %p3240_p4 = scmp.lt.s32.totalorder %s35_s12, %s35_s12 }
   0xd   :  { %p3236_p3 = scmp.ne.s32.totalorder %s35_s12, %s3235_s8  ;;  %p3241_p5 = scmp.lt.s32.totalorder %s3235_s8, %s3235_s8 }
   0xf   :  { %p3242_p6 = por %p3241_p5, %p3240_p4 }
  0x11   :  { %p3243_p7 = pnand %p3242_p6, %p3236_p3 }
  0x13   :  { %3246 = shalt.err (!%p3243_p7)
}
  0x14   :  { %s3320_s20 = smov 256   ;;  %s3321_s21 = smov 16  }
  0x15   :  { %40 = dma.hbm_to_vmem [thread:$0]  %s3517_s1, 4096, %s35_s12, [#allocation6], %s3320_s20, %s3320_s20, %s3321_s21  }
  0x16   :  { %s3322_s24 = smov [#allocation3]   ;;  %s3323_s26 = smov [#allocation7]  }
  0x17   :  { %s25_s25 = sshll.u32 %s3322_s24, 4  ;;  %s48_s27 = sshll.u32 %s3323_s26, 4  ;;  %s26_s25 = int_to_ptr.vmem [resolvable:$true] %s25_s25  ;;  %s49_s27 = int_to_ptr.vmem [resolvable:$true] %s48_s27 }
  0x18   :  { %s3247_s30 = scalar_lea.hbm %s3516_s0, 64 }
  0x19   :  { %p3248_p8 = scmp.ne.s32.totalorder %s3516_s0, %s3247_s30  ;;  %p3251_p9 = scmp.lt.u32.totalorder %s3247_s30, %s3516_s0 }
  0x1b   :  { %p3253_p10 = pnand %p3251_p9, %p3248_p8 }
  0x1d   :  { %3256 = shalt.err (!%p3253_p10)
}
  0x1e   :  { %s3257_s1 = scalar_lea.vmem %s26_s25, 64  ;;  %p3262_p12 = scmp.lt.s32.totalorder %s26_s25, %s26_s25 }
  0x1f   :  { %p3258_p11 = scmp.ne.s32.totalorder %s26_s25, %s3257_s1  ;;  %p3263_p13 = scmp.lt.s32.totalorder %s3257_s1, %s3257_s1 }
  0x21   :  { %p3264_p0 = por %p3263_p13, %p3262_p12 }
  0x23   :  { %p3265_p1 = pnand %p3264_p0, %p3258_p11 }
  0x25   :  { %3268 = shalt.err (!%p3265_p1)
}
  0x26   :  { %28 = dma.hbm_to_vmem [thread:$0]  %s3516_s0, 64, %s26_s25, [#allocation4]  }
  0x27   :  { %s3269_s18 = scalar_lea.hbm %s3519_s3, 16384 }
  0x28   :  { %p3270_p2 = scmp.ne.s32.totalorder %s3519_s3, %s3269_s18  ;;  %p3273_p3 = scmp.lt.u32.totalorder %s3269_s18, %s3519_s3 }
  0x2a   :  { %p3275_p4 = pnand %p3273_p3, %p3270_p2 }
  0x2c   :  { %3278 = shalt.err (!%p3275_p4)
}
  0x2d   :  { %s3279_s24 = scalar_lea.vmem %s49_s27, 16384  ;;  %p3284_p6 = scmp.lt.s32.totalorder %s49_s27, %s49_s27 }
  0x2e   :  { %p3280_p5 = scmp.ne.s32.totalorder %s49_s27, %s3279_s24  ;;  %p3285_p7 = scmp.lt.s32.totalorder %s3279_s24, %s3279_s24 }
  0x30   :  { %p3286_p8 = por %p3285_p7, %p3284_p6 }
  0x32   :  { %p3287_p9 = pnand %p3286_p8, %p3280_p5 }
  0x34   :  { %3290 = shalt.err (!%p3287_p9)
}
  0x35   :  { %54 = dma.hbm_to_vmem [thread:$0]  %s3519_s3, 16384, %s49_s27, [#allocation6], %s3320_s20, %s3320_s20, %s3321_s21  }
  0x36   :  { %s3324_s26 = smov [#allocation8]   ;;  %s3291_s10 = scalar_lea.hbm %s3521_s5, 16384 }
  0x37   :  { %s62_s28 = sshll.u32 %s3324_s26, 4  ;;  %p3292_p10 = scmp.ne.s32.totalorder %s3521_s5, %s3291_s10  ;;  %s63_s28 = int_to_ptr.vmem [resolvable:$true] %s62_s28 }
  0x38   :  { %p3295_p11 = scmp.lt.u32.totalorder %s3291_s10, %s3521_s5 }
  0x3a   :  { %p3297_p12 = pnand %p3295_p11, %p3292_p10 }
  0x3c   :  { %3300 = shalt.err (!%p3297_p12)
}
  0x3d   :  { %s3301_s12 = scalar_lea.vmem %s63_s28, 16384  ;;  %p3306_p0 = scmp.lt.s32.totalorder %s63_s28, %s63_s28 }
  0x3e   :  { %p3302_p13 = scmp.ne.s32.totalorder %s63_s28, %s3301_s12  ;;  %p3307_p1 = scmp.lt.s32.totalorder %s3301_s12, %s3301_s12 }
  0x40   :  { %p3308_p2 = por %p3307_p1, %p3306_p0 }
  0x42   :  { %p3309_p3 = pnand %p3308_p2, %p3302_p13 }
  0x44   :  { %3312 = shalt.err (!%p3309_p3)
}
  0x45   :  { %68 = dma.hbm_to_vmem [thread:$0]  %s3521_s5, 16384, %s63_s28, [#allocation9], %s3320_s20, %s3320_s20, %s3321_s21  }
  0x46   :  { %3313 = dma.done.wait [#allocation4], 64  }
  0x47   :  { %3314 = vsyncadd [#allocation4], 4294967232 }
  0x48   :  { %3315 = dma.done.wait [#allocation6], 20480  }
  0x49   :  { %3316 = vsyncadd [#allocation6], 4294946816 }
  0x4a   :  { %3317 = dma.done.wait [#allocation9], 16384  }
  0x4b   :  { %3318 = vsyncadd [#allocation9], 4294950912  ;;  %v3325_v1 = vmov 0   ;;  %v2793_v2 = vld [vmem:[#allocation5 + $0x4] ss:$16 sps:$4 sm:$0xff]   ;;  %vm2468_vm0 = vcmask 7168  }
  0x4c   :  { %313 = vmatprep.mubr.bf16.mxu0 %v3325_v1  ;;  %354 = vmatprep.mubr.bf16.mxu1 %v3325_v1  ;;  %v2795_v3 = vld [vmem:[#allocation5] ss:$16 sps:$4 sm:$0xff]   ;;  %v2796_v4 = vld [vmem:[#allocation5 + $0x24] ss:$16 sps:$4 sm:$0xff]   ;;  %v2817_v11 = vld [vmem:[#allocation5 + $0xc] ss:$16 sps:$4 sm:$0xff]  }
  0x4d   :  { %281 = vmatprep.subr.bf16.mxu0 %v2793_v2  ;;  %v2798_v5 = vld [vmem:[#allocation5 + $0x20] ss:$16 sps:$4 sm:$0xff]   ;;  %v2799_v6 = vld [vmem:[#allocation5 + $0x44] ss:$16 sps:$4 sm:$0xff]   ;;  %v2819_v12 = vld [vmem:[#allocation5 + $0x8] ss:$16 sps:$4 sm:$0xff]   ;;  %322 = vmatprep.subr.bf16.mxu1 %v2817_v11 }
  0x4e   :  { %282 = vmatpush1.bf16.msra.mxu0 %v2795_v3  ;;  %v2801_v7 = vld [vmem:[#allocation5 + $0x40] ss:$16 sps:$4 sm:$0xff]   ;;  %v2802_v8 = vld [vmem:[#allocation5 + $0x64] ss:$16 sps:$4 sm:$0xff]   ;;  %v2820_v13 = vld [vmem:[#allocation5 + $0x2c] ss:$16 sps:$4 sm:$0xff]   ;;  %323 = vmatpush1.bf16.msra.mxu1 %v2819_v12 }
  0x4f   :  { %283 = vmatprep.subr.bf16.mxu0 %v2796_v4  ;;  %v2804_v9 = vld [vmem:[#allocation5 + $0x60] ss:$16 sps:$4 sm:$0xff]   ;;  %v2805_v10 = vld [vmem:[#allocation5 + $0x84] ss:$16 sps:$4 sm:$0xff]   ;;  %v2822_v15 = vld [vmem:[#allocation5 + $0x28] ss:$16 sps:$4 sm:$0xff]   ;;  %324 = vmatprep.subr.bf16.mxu1 %v2820_v13 }
  0x50   :  { %v2807_v14 = vld [vmem:[#allocation5 + $0x80] ss:$16 sps:$4 sm:$0xff]   ;;  %v2823_v16 = vld [vmem:[#allocation5 + $0x4c] ss:$16 sps:$4 sm:$0xff]   ;;  %v2808_v17 = vld [vmem:[#allocation5 + $0xa4] ss:$16 sps:$4 sm:$0xff]  }
  0x51   :  { %v2810_v18 = vld [vmem:[#allocation5 + $0xa0] ss:$16 sps:$4 sm:$0xff]   ;;  %v2825_v19 = vld [vmem:[#allocation5 + $0x48] ss:$16 sps:$4 sm:$0xff]   ;;  %v2826_v20 = vld [vmem:[#allocation5 + $0x6c] ss:$16 sps:$4 sm:$0xff]  }
  0x52   :  { %284 = vmatpush1.bf16.msra.mxu0 %v2798_v5  ;;  %325 = vmatpush1.bf16.msra.mxu1 %v2822_v15  ;;  %v2811_v21 = vld [vmem:[#allocation5 + $0xc4] ss:$16 sps:$4 sm:$0xff]   ;;  %v2813_v22 = vld [vmem:[#allocation5 + $0xc0] ss:$16 sps:$4 sm:$0xff]   ;;  %v2828_v23 = vld [vmem:[#allocation5 + $0x68] ss:$16 sps:$4 sm:$0xff]  }
  0x53   :  { %285 = vmatprep.subr.bf16.mxu0 %v2799_v6  ;;  %326 = vmatprep.subr.bf16.mxu1 %v2823_v16  ;;  %v2829_v24 = vld [vmem:[#allocation5 + $0x8c] ss:$16 sps:$4 sm:$0xff]   ;;  %v2814_v25 = vld [vmem:[#allocation5 + $0xe4] ss:$16 sps:$4 sm:$0xff]   ;;  %v2816_v26 = vld [vmem:[#allocation5 + $0xe0] ss:$16 sps:$4 sm:$0xff]  }
  0x54   :  { %v2831_v27 = vld [vmem:[#allocation5 + $0x88] ss:$16 sps:$4 sm:$0xff]   ;;  %v2832_v28 = vld [vmem:[#allocation5 + $0xac] ss:$16 sps:$4 sm:$0xff]   ;;  %v2843_v29 = vld [vmem:[#allocation7 + $0x4] ss:$16 sps:$4 sm:$0xff]  }
  0x55   :  { %v88_v30 = vld [vmem:[#allocation3] sm:$0xf]  ;;  %v2834_v31 = vld [vmem:[#allocation5 + $0xa8] ss:$16 sps:$4 sm:$0xff]   ;;  %v2841_v33 = vld [vmem:[#allocation7] ss:$16 sps:$4 sm:$0xff]  }
  0x56   :  { %286 = vmatpush1.bf16.msra.mxu0 %v2801_v7  ;;  %327 = vmatpush1.bf16.msra.mxu1 %v2825_v19  ;;  %v2835_v32 = vld [vmem:[#allocation5 + $0xcc] ss:$16 sps:$4 sm:$0xff]   ;;  %v2849_v34 = vld [vmem:[#allocation7 + $0x24] ss:$16 sps:$4 sm:$0xff]   ;;  %v2837_v35 = vld [vmem:[#allocation5 + $0xc8] ss:$16 sps:$4 sm:$0xff]  }
  0x57   :  { %287 = vmatprep.subr.bf16.mxu0 %v2802_v8  ;;  %328 = vmatprep.subr.bf16.mxu1 %v2826_v20  ;;  %v2838_v36 = vld [vmem:[#allocation5 + $0xec] ss:$16 sps:$4 sm:$0xff]   ;;  %v2847_v37 = vld [vmem:[#allocation7 + $0x20] ss:$16 sps:$4 sm:$0xff]   ;;  %v2855_v38 = vld [vmem:[#allocation7 + $0x44] ss:$16 sps:$4 sm:$0xff]  }
  0x58   :  { %v2840_v39 = vld [vmem:[#allocation5 + $0xe8] ss:$16 sps:$4 sm:$0xff]   ;;  %v2846_v40 = vld [vmem:[#allocation7 + $0xc] ss:$16 sps:$4 sm:$0xff]   ;;  %v2853_v41 = vld [vmem:[#allocation7 + $0x40] ss:$16 sps:$4 sm:$0xff]  }
  0x59   :  { %v2861_v42 = vld [vmem:[#allocation7 + $0x64] ss:$16 sps:$4 sm:$0xff]   ;;  %v2844_v43 = vld [vmem:[#allocation7 + $0x8] ss:$16 sps:$4 sm:$0xff]   ;;  %v2852_v44 = vld [vmem:[#allocation7 + $0x2c] ss:$16 sps:$4 sm:$0xff]  }
  0x5a   :  { %288 = vmatpush1.bf16.msra.mxu0 %v2804_v9  ;;  %329 = vmatpush1.bf16.msra.mxu1 %v2828_v23  ;;  %v2859_v45 = vld [vmem:[#allocation7 + $0x60] ss:$16 sps:$4 sm:$0xff]   ;;  %v2867_v46 = vld [vmem:[#allocation7 + $0x84] ss:$16 sps:$4 sm:$0xff]   ;;  %v2850_v47 = vld [vmem:[#allocation7 + $0x28] ss:$16 sps:$4 sm:$0xff]  }
  0x5b   :  { %289 = vmatprep.subr.bf16.mxu0 %v2805_v10  ;;  %330 = vmatprep.subr.bf16.mxu1 %v2829_v24  ;;  %v2858_v48 = vld [vmem:[#allocation7 + $0x4c] ss:$16 sps:$4 sm:$0xff]   ;;  %v2865_v49 = vld [vmem:[#allocation7 + $0x80] ss:$16 sps:$4 sm:$0xff]   ;;  %v2873_v50 = vld [vmem:[#allocation7 + $0xa4] ss:$16 sps:$4 sm:$0xff]  }
  0x5c   :  { %v2856_v51 = vld [vmem:[#allocation7 + $0x48] ss:$16 sps:$4 sm:$0xff]   ;;  %v2864_v52 = vld [vmem:[#allocation7 + $0x6c] ss:$16 sps:$4 sm:$0xff]   ;;  %v2871_v53 = vld [vmem:[#allocation7 + $0xa0] ss:$16 sps:$4 sm:$0xff]  }
  0x5d   :  { %v2879_v54 = vld [vmem:[#allocation7 + $0xc4] ss:$16 sps:$4 sm:$0xff]   ;;  %v2862_v55 = vld [vmem:[#allocation7 + $0x68] ss:$16 sps:$4 sm:$0xff]   ;;  %v2870_v56 = vld [vmem:[#allocation7 + $0x8c] ss:$16 sps:$4 sm:$0xff]  }
  0x5e   :  { %290 = vmatpush1.bf16.msra.mxu0 %v2807_v14  ;;  %331 = vmatpush1.bf16.msra.mxu1 %v2831_v27  ;;  %v2877_v57 = vld [vmem:[#allocation7 + $0xc0] ss:$16 sps:$4 sm:$0xff]   ;;  %v2885_v58 = vld [vmem:[#allocation7 + $0xe4] ss:$16 sps:$4 sm:$0xff]   ;;  %v2868_v59 = vld [vmem:[#allocation7 + $0x88] ss:$16 sps:$4 sm:$0xff]  }
  0x5f   :  { %291 = vmatprep.subr.bf16.mxu0 %v2808_v17  ;;  %332 = vmatprep.subr.bf16.mxu1 %v2832_v28  ;;  %v2876_v60 = vld [vmem:[#allocation7 + $0xac] ss:$16 sps:$4 sm:$0xff]   ;;  %v2883_v61 = vld [vmem:[#allocation7 + $0xe0] ss:$16 sps:$4 sm:$0xff]   ;;  %v2891_v62 = vld [vmem:[#allocation7 + $0x104] ss:$16 sps:$4 sm:$0xff]  }
  0x60   :  { %v2874_v63 = vld [vmem:[#allocation7 + $0xa8] ss:$16 sps:$4 sm:$0xff]   ;;  %v2882_v0 = vld [vmem:[#allocation7 + $0xcc] ss:$16 sps:$4 sm:$0xff]   ;;  %v2889_v2 = vld [vmem:[#allocation7 + $0x100] ss:$16 sps:$4 sm:$0xff]  }
  0x61   :  { %v2897_v3 = vld [vmem:[#allocation7 + $0x124] ss:$16 sps:$4 sm:$0xff]   ;;  %v2880_v4 = vld [vmem:[#allocation7 + $0xc8] ss:$16 sps:$4 sm:$0xff]   ;;  %v2888_v5 = vld [vmem:[#allocation7 + $0xec] ss:$16 sps:$4 sm:$0xff]  }
  0x62   :  { %292 = vmatpush1.bf16.msra.mxu0 %v2810_v18  ;;  %333 = vmatpush1.bf16.msra.mxu1 %v2834_v31  ;;  %v2895_v6 = vld [vmem:[#allocation7 + $0x120] ss:$16 sps:$4 sm:$0xff]   ;;  %v2903_v7 = vld [vmem:[#allocation7 + $0x144] ss:$16 sps:$4 sm:$0xff]   ;;  %v2886_v8 = vld [vmem:[#allocation7 + $0xe8] ss:$16 sps:$4 sm:$0xff]  }
  0x63   :  { %293 = vmatprep.subr.bf16.mxu0 %v2811_v21  ;;  %334 = vmatprep.subr.bf16.mxu1 %v2835_v32  ;;  %v2894_v9 = vld [vmem:[#allocation7 + $0x10c] ss:$16 sps:$4 sm:$0xff]   ;;  %v2901_v10 = vld [vmem:[#allocation7 + $0x140] ss:$16 sps:$4 sm:$0xff]   ;;  %v2909_v11 = vld [vmem:[#allocation7 + $0x164] ss:$16 sps:$4 sm:$0xff]  }
  0x64   :  { %v2892_v12 = vld [vmem:[#allocation7 + $0x108] ss:$16 sps:$4 sm:$0xff]   ;;  %v2900_v13 = vld [vmem:[#allocation7 + $0x12c] ss:$16 sps:$4 sm:$0xff]   ;;  %v2907_v14 = vld [vmem:[#allocation7 + $0x160] ss:$16 sps:$4 sm:$0xff]  }
  0x65   :  { %v2915_v15 = vld [vmem:[#allocation7 + $0x184] ss:$16 sps:$4 sm:$0xff]   ;;  %v2898_v16 = vld [vmem:[#allocation7 + $0x128] ss:$16 sps:$4 sm:$0xff]   ;;  %v2906_v17 = vld [vmem:[#allocation7 + $0x14c] ss:$16 sps:$4 sm:$0xff]  }
  0x66   :  { %294 = vmatpush1.bf16.msra.mxu0 %v2813_v22  ;;  %335 = vmatpush1.bf16.msra.mxu1 %v2837_v35  ;;  %v2913_v18 = vld [vmem:[#allocation7 + $0x180] ss:$16 sps:$4 sm:$0xff]   ;;  %v2921_v19 = vld [vmem:[#allocation7 + $0x1a4] ss:$16 sps:$4 sm:$0xff]   ;;  %v2904_v20 = vld [vmem:[#allocation7 + $0x148] ss:$16 sps:$4 sm:$0xff]  }
  0x67   :  { %295 = vmatprep.subr.bf16.mxu0 %v2814_v25  ;;  %336 = vmatprep.subr.bf16.mxu1 %v2838_v36  ;;  %v2912_v21 = vld [vmem:[#allocation7 + $0x16c] ss:$16 sps:$4 sm:$0xff]   ;;  %v2919_v22 = vld [vmem:[#allocation7 + $0x1a0] ss:$16 sps:$4 sm:$0xff]   ;;  %v2910_v23 = vld [vmem:[#allocation7 + $0x168] ss:$16 sps:$4 sm:$0xff]  }
  0x68   :  { %v2918_v24 = vld [vmem:[#allocation7 + $0x18c] ss:$16 sps:$4 sm:$0xff]   ;;  %v2916_v25 = vld [vmem:[#allocation7 + $0x188] ss:$16 sps:$4 sm:$0xff]   ;;  %v2927_v28 = vld [vmem:[#allocation7 + $0x1c4] ss:$16 sps:$4 sm:$0xff]  }
  0x69   :  { %v2922_v27 = vld [vmem:[#allocation7 + $0x1a8] ss:$16 sps:$4 sm:$0xff]   ;;  %v2933_v32 = vld [vmem:[#allocation7 + $0x1e4] ss:$16 sps:$4 sm:$0xff]  }
  0x6a   :  { %296 = vmatpush1.bf16.msra.mxu0 %v2816_v26  ;;  %337 = vmatpush1.bf16.msra.mxu1 %v2840_v39  ;;  %v2924_v26 = vld [vmem:[#allocation7 + $0x1ac] ss:$16 sps:$4 sm:$0xff]   ;;  %v2928_v31 = vld [vmem:[#allocation7 + $0x1c8] ss:$16 sps:$4 sm:$0xff]   ;;  %v2939_v36 = vld [vmem:[#allocation7 + $0x204] ss:$16 sps:$4 sm:$0xff]  }
  0x6b   :  { %1197 = vmatprep.subr.bf16.mxu0 %v2843_v29  ;;  %1279 = vmatprep.subr.bf16.mxu1 %v2846_v40  ;;  %v2930_v29 = vld [vmem:[#allocation7 + $0x1cc] ss:$16 sps:$4 sm:$0xff]   ;;  %v2934_v35 = vld [vmem:[#allocation7 + $0x1e8] ss:$16 sps:$4 sm:$0xff]   ;;  %v380_v40 = vlaneseq }
  0x6d   :  { %314 = vmatmul.mubr.bf16.vlgmr.msra.gmra.mrb[0].mxu0 %v88_v30  ;;  %355 = vmatmul.mubr.bf16.vlgmr.msra.gmra.mrb[0].mxu1 %v88_v30  ;;  %v2925_v30 = vld [vmem:[#allocation7 + $0x1c0] ss:$16 sps:$4 sm:$0xff]  }
  0x6e   :  { %1198 = vmatpush1.bf16.msra.mxu0 %v2841_v33  ;;  %1280 = vmatpush1.bf16.msra.mxu1 %v2844_v43  ;;  %v2936_v33 = vld [vmem:[#allocation7 + $0x1ec] ss:$16 sps:$4 sm:$0xff]  }
  0x6f   :  { %1199 = vmatprep.subr.bf16.mxu0 %v2849_v34  ;;  %1281 = vmatprep.subr.bf16.mxu1 %v2852_v44  ;;  %v2931_v34 = vld [vmem:[#allocation7 + $0x1e0] ss:$16 sps:$4 sm:$0xff]   ;;  %v2509_v43 = vld.sshfl [vmem:[%s3518_s2] sm:$0x33 pattern:$0x75316420] }
  0x72   :  { %1200 = vmatpush1.bf16.msra.mxu0 %v2847_v37  ;;  %1282 = vmatpush1.bf16.msra.mxu1 %v2850_v47  ;;  %v2942_v37 = vld [vmem:[#allocation7 + $0x20c] ss:$16 sps:$4 sm:$0xff]  }
  0x73   :  { %1201 = vmatprep.subr.bf16.mxu0 %v2855_v38  ;;  %1283 = vmatprep.subr.bf16.mxu1 %v2858_v48  ;;  %v3326_v38 = vmov 1966171168  }
  0x74   :  { %v378_v39 = vunpack.c.l.s4 %v3326_v38  ;;  %v2979_v38 = vld [vmem:[#allocation7 + $0x2e0] ss:$16 sps:$4 sm:$0xff]  }
  0x76   :  { %1202 = vmatpush1.bf16.msra.mxu0 %v2853_v41  ;;  %1284 = vmatpush1.bf16.msra.mxu1 %v2856_v51  ;;  %v379_v41 = vunpack.c.0.s8 %v378_v39  ;;  %v2982_v39 = vld [vmem:[#allocation7 + $0x2e8] ss:$16 sps:$4 sm:$0xff]  }
  0x77   :  { %1203 = vmatprep.subr.bf16.mxu0 %v2861_v42  ;;  %1285 = vmatprep.subr.bf16.mxu1 %v2864_v52  ;;  %v3439_v42 = vshrl.u32 %v380_v40, 7  ;;  %v2987_v40 = vld [vmem:[#allocation7 + $0x304] ss:$16 sps:$4 sm:$0xff]  }
  0x79   :  { %v3445_v44 = vsub.s32 %v379_v41, %v3439_v42  ;;  %v2990_v41 = vld [vmem:[#allocation7 + $0x30c] ss:$16 sps:$4 sm:$0xff]  }
  0x7a   :  { %1204 = vmatpush1.bf16.msra.mxu0 %v2859_v45  ;;  %1286 = vmatpush1.bf16.msra.mxu1 %v2862_v55  ;;  %v376_v45 = vcombine.high %v2509_v43, %v2509_v43 }
  0x7b   :  { %1205 = vmatprep.subr.bf16.mxu0 %v2867_v46  ;;  %1287 = vmatprep.subr.bf16.mxu1 %v2870_v56  ;;  %v3448_v46 = vrot.slane %v2509_v43, %v3445_v44  ;;  %v2985_v43 = vld [vmem:[#allocation7 + $0x300] ss:$16 sps:$4 sm:$0xff]  }
  0x7c   :  { %v390_v47 = vrot.slane %v376_v45, %v3445_v44  ;;  %v2988_v45 = vld [vmem:[#allocation7 + $0x308] ss:$16 sps:$4 sm:$0xff]  }
  0x7d   :  { %v394_v48 = vpack.i.b16 %v3448_v46, %v3448_v46 }
  0x7e   :  { %1206 = vmatpush1.bf16.msra.mxu0 %v2865_v49  ;;  %1288 = vmatpush1.bf16.msra.mxu1 %v2868_v59  ;;  %v3454_v49 = vsub.s32 0, %v3439_v42 }
  0x7f   :  { %1207 = vmatprep.subr.bf16.mxu0 %v2873_v50  ;;  %1289 = vmatprep.subr.bf16.mxu1 %v2876_v60  ;;  %v401_v50 = vpack.i.b16 %v390_v47, %v390_v47  ;;  %v392_v60 = vcombine.high %v390_v47, %v390_v47  ;;  %v2993_v47 = vld [vmem:[#allocation7 + $0x324] ss:$16 sps:$4 sm:$0xff]  }
  0x80   :  { %v399_v51 = vrot.slane %v394_v48, %v3454_v49  ;;  %v2996_v48 = vld [vmem:[#allocation7 + $0x32c] ss:$16 sps:$4 sm:$0xff]  }
  0x82   :  { %1208 = vmatpush1.bf16.msra.mxu0 %v2871_v53  ;;  %1290 = vmatpush1.bf16.msra.mxu1 %v2874_v63  ;;  %v406_v53 = vrot.slane %v401_v50, %v3454_v49  ;;  %v2937_v63 = vld [vmem:[#allocation7 + $0x200] ss:$16 sps:$4 sm:$0xff]  }
  0x83   :  { %1209 = vmatprep.subr.bf16.mxu0 %v2879_v54  ;;  %1291 = vmatprep.subr.bf16.mxu1 %v2882_v0  ;;  %v2940_v0 = vld [vmem:[#allocation7 + $0x208] ss:$16 sps:$4 sm:$0xff]   ;;  %v2991_v50 = vld [vmem:[#allocation7 + $0x320] ss:$16 sps:$4 sm:$0xff]  }
  0x86   :  { %1210 = vmatpush1.bf16.msra.mxu0 %v2877_v57  ;;  %1292 = vmatpush1.bf16.msra.mxu1 %v2880_v4  ;;  %v2948_v4 = vld [vmem:[#allocation7 + $0x22c] ss:$16 sps:$4 sm:$0xff]  }
  0x87   :  { %1211 = vmatprep.subr.bf16.mxu0 %v2885_v58  ;;  %1293 = vmatprep.subr.bf16.mxu1 %v2888_v5  ;;  %v415_v5 = vpack.i.b16 %v392_v60, %v392_v60  ;;  %v3011_v60 = vld [vmem:[#allocation7 + $0x384] ss:$16 sps:$4 sm:$0xff]  }
  0x8a   :  { %1212 = vmatpush1.bf16.msra.mxu0 %v2883_v61  ;;  %1294 = vmatpush1.bf16.msra.mxu1 %v2886_v8  ;;  %v2951_v8 = vld [vmem:[#allocation7 + $0x244] ss:$16 sps:$4 sm:$0xff]  }
  0x8b   :  { %1213 = vmatprep.subr.bf16.mxu0 %v2891_v62  ;;  %1295 = vmatprep.subr.bf16.mxu1 %v2894_v9  ;;  %v2954_v9 = vld [vmem:[#allocation7 + $0x24c] ss:$16 sps:$4 sm:$0xff]  }
  0x8e   :  { %1214 = vmatpush1.bf16.msra.mxu0 %v2889_v2  ;;  %1296 = vmatpush1.bf16.msra.mxu1 %v2892_v12 }
  0x8f   :  { %1215 = vmatprep.subr.bf16.mxu0 %v2897_v3  ;;  %1297 = vmatprep.subr.bf16.mxu1 %v2900_v13  ;;  %v2945_v3 = vld [vmem:[#allocation7 + $0x224] ss:$16 sps:$4 sm:$0xff]  }
  0x92   :  { %1216 = vmatpush1.bf16.msra.mxu0 %v2895_v6  ;;  %1298 = vmatpush1.bf16.msra.mxu1 %v2898_v16  ;;  %v2943_v6 = vld [vmem:[#allocation7 + $0x220] ss:$16 sps:$4 sm:$0xff]   ;;  %v2952_v16 = vld [vmem:[#allocation7 + $0x248] ss:$16 sps:$4 sm:$0xff]  }
  0x93   :  { %1217 = vmatprep.subr.bf16.mxu0 %v2903_v7  ;;  %1299 = vmatprep.subr.bf16.mxu1 %v2906_v17  ;;  %v2946_v7 = vld [vmem:[#allocation7 + $0x228] ss:$16 sps:$4 sm:$0xff]  }
  0x96   :  { %1218 = vmatpush1.bf16.msra.mxu0 %v2901_v10  ;;  %1300 = vmatpush1.bf16.msra.mxu1 %v2904_v20 }
  0x97   :  { %1219 = vmatprep.subr.bf16.mxu0 %v2909_v11  ;;  %1301 = vmatprep.subr.bf16.mxu1 %v2912_v21  ;;  %v420_v11 = vrot.slane %v415_v5, %v3454_v49  ;;  %v3018_v5 = vld [vmem:[#allocation7 + $0x3a8] ss:$16 sps:$4 sm:$0xff]  }
  0x9a   :  { %1220 = vmatpush1.bf16.msra.mxu0 %v2907_v14  ;;  %1302 = vmatpush1.bf16.msra.mxu1 %v2910_v23  ;;  %v2958_v23 = vld [vmem:[#allocation7 + $0x268] ss:$16 sps:$4 sm:$0xff]  }
  0x9b   :  { %1221 = vmatprep.subr.bf16.mxu0 %v2915_v15  ;;  %1303 = vmatprep.subr.bf16.mxu1 %v2918_v24  ;;  %v2949_v15 = vld [vmem:[#allocation7 + $0x240] ss:$16 sps:$4 sm:$0xff]   ;;  %v2963_v24 = vld [vmem:[#allocation7 + $0x284] ss:$16 sps:$4 sm:$0xff]  }
  0x9e   :  { %1222 = vmatpush1.bf16.msra.mxu0 %v2913_v18  ;;  %1304 = vmatpush1.bf16.msra.mxu1 %v2916_v25  ;;  %v2957_v18 = vld [vmem:[#allocation7 + $0x264] ss:$16 sps:$4 sm:$0xff]   ;;  %v2966_v25 = vld [vmem:[#allocation7 + $0x28c] ss:$16 sps:$4 sm:$0xff]  }
  0x9f   :  { %1223 = vmatprep.subr.bf16.mxu0 %v2921_v19  ;;  %1305 = vmatprep.subr.bf16.mxu1 %v2924_v26  ;;  %v2960_v19 = vld [vmem:[#allocation7 + $0x26c] ss:$16 sps:$4 sm:$0xff]   ;;  %v2961_v26 = vld [vmem:[#allocation7 + $0x280] ss:$16 sps:$4 sm:$0xff]  }
  0xa2   :  { %1224 = vmatpush1.bf16.msra.mxu0 %v2919_v22  ;;  %1306 = vmatpush1.bf16.msra.mxu1 %v2922_v27  ;;  %v2955_v22 = vld [vmem:[#allocation7 + $0x260] ss:$16 sps:$4 sm:$0xff]   ;;  %v2964_v27 = vld [vmem:[#allocation7 + $0x288] ss:$16 sps:$4 sm:$0xff]  }
  0xa3   :  { %1225 = vmatprep.subr.bf16.mxu0 %v2927_v28  ;;  %1307 = vmatprep.subr.bf16.mxu1 %v2930_v29  ;;  %v2969_v28 = vld [vmem:[#allocation7 + $0x2a4] ss:$16 sps:$4 sm:$0xff]   ;;  %v2972_v29 = vld [vmem:[#allocation7 + $0x2ac] ss:$16 sps:$4 sm:$0xff]  }
  0xa6   :  { %1226 = vmatpush1.bf16.msra.mxu0 %v2925_v30  ;;  %1308 = vmatpush1.bf16.msra.mxu1 %v2928_v31  ;;  %v2967_v30 = vld [vmem:[#allocation7 + $0x2a0] ss:$16 sps:$4 sm:$0xff]   ;;  %v2970_v31 = vld [vmem:[#allocation7 + $0x2a8] ss:$16 sps:$4 sm:$0xff]  }
  0xa7   :  { %1227 = vmatprep.subr.bf16.mxu0 %v2933_v32  ;;  %1309 = vmatprep.subr.bf16.mxu1 %v2936_v33  ;;  %v2975_v32 = vld [vmem:[#allocation7 + $0x2c4] ss:$16 sps:$4 sm:$0xff]   ;;  %v2978_v33 = vld [vmem:[#allocation7 + $0x2cc] ss:$16 sps:$4 sm:$0xff]  }
  0xaa   :  { %1228 = vmatpush1.bf16.msra.mxu0 %v2931_v34  ;;  %1310 = vmatpush1.bf16.msra.mxu1 %v2934_v35  ;;  %v2973_v34 = vld [vmem:[#allocation7 + $0x2c0] ss:$16 sps:$4 sm:$0xff]   ;;  %v2976_v35 = vld [vmem:[#allocation7 + $0x2c8] ss:$16 sps:$4 sm:$0xff]  }
  0xab   :  { %1238 = vmatprep.subr.bf16.mxu0 %v2939_v36  ;;  %1320 = vmatprep.subr.bf16.mxu1 %v2942_v37  ;;  %v2981_v36 = vld [vmem:[#allocation7 + $0x2e4] ss:$16 sps:$4 sm:$0xff]   ;;  %v2984_v37 = vld [vmem:[#allocation7 + $0x2ec] ss:$16 sps:$4 sm:$0xff]  }
 0x140   :  { %v315_v52 = vpop.f32.mrb[0].mxu0  ;;  %v3460_v10 = vpop.f32.mrb[0].mxu1 }
 0x141   :  { %v363_v54 = vpack.c.bf16 %v315_v52, %v315_v52  ;;  %v317_v55 = vpop.f32.mrb[1].mxu0  ;;  %v358_v12 = vpop.f32.mrb[1].mxu1  ;;  %v2999_v52 = vld [vmem:[#allocation7 + $0x344] ss:$16 sps:$4 sm:$0xff]  }
 0x142   :  { %v364_v56 = vpack.c.bf16 %v317_v55, %v317_v55  ;;  %v319_v57 = vpop.f32.mrb[2].mxu0  ;;  %v366_v13 = vpack.c.bf16 %v358_v12, %v358_v12  ;;  %v360_v14 = vpop.f32.mrb[2].mxu1  ;;  %v3000_v55 = vld [vmem:[#allocation7 + $0x348] ss:$16 sps:$4 sm:$0xff]   ;;  %v365_v12 = vpack.c.bf16 %v3460_v10, %v3460_v10 }
 0x143   :  { %v421_v58 = vadd.bf16 %v399_v51, %v363_v54  ;;  %v320_v59 = vpop.f32.mrb[3].mxu0  ;;  %v361_v17 = vpop.f32.mrb[3].mxu1  ;;  %v2994_v51 = vld [vmem:[#allocation7 + $0x328] ss:$16 sps:$4 sm:$0xff]   ;;  %v2997_v54 = vld [vmem:[#allocation7 + $0x340] ss:$16 sps:$4 sm:$0xff]  }
 0x144   :  { %v422_v61 = vadd.bf16 %v406_v53, %v364_v56  ;;  %v424_v20 = vadd.bf16 %v420_v11, %v366_v13  ;;  %v3002_v53 = vld [vmem:[#allocation7 + $0x34c] ss:$16 sps:$4 sm:$0xff]   ;;  %v3005_v56 = vld [vmem:[#allocation7 + $0x364] ss:$16 sps:$4 sm:$0xff]   ;;  %v3006_v59 = vld [vmem:[#allocation7 + $0x368] ss:$16 sps:$4 sm:$0xff]  }
 0x145   :  { %v425_v2 = vmax.bf16 %v3325_v1, %v421_v58  ;;  %v3008_v57 = vld [vmem:[#allocation7 + $0x36c] ss:$16 sps:$4 sm:$0xff]   ;;  %v3003_v58 = vld [vmem:[#allocation7 + $0x360] ss:$16 sps:$4 sm:$0xff]   ;;  %v3024_v11 = vld [vmem:[#allocation7 + $0x3c8] ss:$16 sps:$4 sm:$0xff]  }
 0x146   :  { %v426_v62 = vmax.bf16 %v3325_v1, %v422_v61  ;;  %v428_v21 = vmax.bf16 %v3325_v1, %v424_v20  ;;  %v3014_v61 = vld [vmem:[#allocation7 + $0x38c] ss:$16 sps:$4 sm:$0xff]   ;;  %v3029_v13 = vld [vmem:[#allocation7 + $0x3e4] ss:$16 sps:$4 sm:$0xff]   ;;  %v3033_v20 = vld [vmem:[#allocation8] ss:$16 sps:$4 sm:$0xff]  }
 0x147   :  { %v3032_v14 = vld [vmem:[#allocation7 + $0x3ec] ss:$16 sps:$4 sm:$0xff]  }
 0x148   :  { %1229 = vmatprep.mubr.bf16.mxu0 %v426_v62  ;;  %1311 = vmatprep.mubr.bf16.mxu1 %v426_v62  ;;  %v3009_v62 = vld [vmem:[#allocation7 + $0x380] ss:$16 sps:$4 sm:$0xff]  }
 0x149   :  { %1230 = vmatmul.mubr.bf16.vlgmr.msra.gmra.mrb[4].mxu0 %v425_v2  ;;  %1312 = vmatmul.mubr.bf16.vlgmr.msra.gmra.mrb[4].mxu1 %v425_v2  ;;  %v3017_v2 = vld [vmem:[#allocation7 + $0x3a4] ss:$16 sps:$4 sm:$0xff]  }
 0x14a   :  { %1239 = vmatpush1.bf16.msra.mxu0 %v2937_v63  ;;  %1321 = vmatpush1.bf16.msra.mxu1 %v2940_v0  ;;  %v3012_v63 = vld [vmem:[#allocation7 + $0x388] ss:$16 sps:$4 sm:$0xff]   ;;  %v391_v0 = vcombine.high %v3448_v46, %v3448_v46 }
 0x14b   :  { %1240 = vmatprep.subr.bf16.mxu0 %v2945_v3  ;;  %1322 = vmatprep.subr.bf16.mxu1 %v2948_v4  ;;  %v3020_v3 = vld [vmem:[#allocation7 + $0x3ac] ss:$16 sps:$4 sm:$0xff]   ;;  %v3015_v4 = vld [vmem:[#allocation7 + $0x3a0] ss:$16 sps:$4 sm:$0xff]  }
 0x14c   :  { %1270 = vmatprep.mubr.bf16.mxu0 %v428_v21  ;;  %1352 = vmatprep.mubr.bf16.mxu1 %v428_v21  ;;  %v3036_v21 = vld [vmem:[#allocation8 + $0x8] ss:$16 sps:$4 sm:$0xff]  }
 0x14e   :  { %1241 = vmatpush1.bf16.msra.mxu0 %v2943_v6  ;;  %1323 = vmatpush1.bf16.msra.mxu1 %v2946_v7  ;;  %v408_v6 = vpack.i.b16 %v391_v0, %v391_v0  ;;  %v3023_v7 = vld [vmem:[#allocation7 + $0x3c4] ss:$16 sps:$4 sm:$0xff]   ;;  %v3093_v0 = vld [vmem:[#allocation8 + $0x140] ss:$16 sps:$4 sm:$0xff]  }
 0x14f   :  { %1242 = vmatprep.subr.bf16.mxu0 %v2951_v8  ;;  %1324 = vmatprep.subr.bf16.mxu1 %v2954_v9  ;;  %v3026_v8 = vld [vmem:[#allocation7 + $0x3cc] ss:$16 sps:$4 sm:$0xff]   ;;  %v3021_v9 = vld [vmem:[#allocation7 + $0x3c0] ss:$16 sps:$4 sm:$0xff]  }
 0x150   :  { %v413_v46 = vrot.slane %v408_v6, %v3454_v49  ;;  %v3102_v6 = vld [vmem:[#allocation8 + $0x168] ss:$16 sps:$4 sm:$0xff]  }
 0x152   :  { %1243 = vmatpush1.bf16.msra.mxu0 %v2949_v15  ;;  %1325 = vmatpush1.bf16.msra.mxu1 %v2952_v16  ;;  %v3027_v15 = vld [vmem:[#allocation7 + $0x3e0] ss:$16 sps:$4 sm:$0xff]   ;;  %v3030_v16 = vld [vmem:[#allocation7 + $0x3e8] ss:$16 sps:$4 sm:$0xff]   ;;  %v423_v17 = vadd.bf16 %v413_v46, %v365_v12  ;;  %v3113_v12 = vld [vmem:[#allocation8 + $0x1a4] ss:$16 sps:$4 sm:$0xff]  }
 0x153   :  { %1244 = vmatprep.subr.bf16.mxu0 %v2957_v18  ;;  %1326 = vmatprep.subr.bf16.mxu1 %v2960_v19  ;;  %v3035_v18 = vld [vmem:[#allocation8 + $0x4] ss:$16 sps:$4 sm:$0xff]   ;;  %v3038_v19 = vld [vmem:[#allocation8 + $0xc] ss:$16 sps:$4 sm:$0xff]  }
 0x154   :  { %v427_v10 = vmax.bf16 %v3325_v1, %v423_v17  ;;  %v3116_v46 = vld [vmem:[#allocation8 + $0x1ac] ss:$16 sps:$4 sm:$0xff]   ;;  %v3117_v17 = vld [vmem:[#allocation8 + $0x1c0] ss:$16 sps:$4 sm:$0xff]  }
 0x156   :  { %1245 = vmatpush1.bf16.msra.mxu0 %v2955_v22  ;;  %1327 = vmatpush1.bf16.msra.mxu1 %v2958_v23  ;;  %v3041_v22 = vld [vmem:[#allocation8 + $0x24] ss:$16 sps:$4 sm:$0xff]   ;;  %v3044_v23 = vld [vmem:[#allocation8 + $0x2c] ss:$16 sps:$4 sm:$0xff]  }
 0x157   :  { %1246 = vmatprep.subr.bf16.mxu0 %v2963_v24  ;;  %1328 = vmatprep.subr.bf16.mxu1 %v2966_v25  ;;  %v3039_v24 = vld [vmem:[#allocation8 + $0x20] ss:$16 sps:$4 sm:$0xff]   ;;  %v3042_v25 = vld [vmem:[#allocation8 + $0x28] ss:$16 sps:$4 sm:$0xff]  }
 0x15a   :  { %1247 = vmatpush1.bf16.msra.mxu0 %v2961_v26  ;;  %1329 = vmatpush1.bf16.msra.mxu1 %v2964_v27  ;;  %v3047_v26 = vld [vmem:[#allocation8 + $0x44] ss:$16 sps:$4 sm:$0xff]   ;;  %v3050_v27 = vld [vmem:[#allocation8 + $0x4c] ss:$16 sps:$4 sm:$0xff]  }
 0x15b   :  { %1248 = vmatprep.subr.bf16.mxu0 %v2969_v28  ;;  %1330 = vmatprep.subr.bf16.mxu1 %v2972_v29  ;;  %v3045_v28 = vld [vmem:[#allocation8 + $0x40] ss:$16 sps:$4 sm:$0xff]   ;;  %v3048_v29 = vld [vmem:[#allocation8 + $0x48] ss:$16 sps:$4 sm:$0xff]  }
 0x15e   :  { %1249 = vmatpush1.bf16.msra.mxu0 %v2967_v30  ;;  %1331 = vmatpush1.bf16.msra.mxu1 %v2970_v31  ;;  %v3053_v30 = vld [vmem:[#allocation8 + $0x64] ss:$16 sps:$4 sm:$0xff]   ;;  %v3056_v31 = vld [vmem:[#allocation8 + $0x6c] ss:$16 sps:$4 sm:$0xff]  }
 0x15f   :  { %1250 = vmatprep.subr.bf16.mxu0 %v2975_v32  ;;  %1332 = vmatprep.subr.bf16.mxu1 %v2978_v33  ;;  %v3051_v32 = vld [vmem:[#allocation8 + $0x60] ss:$16 sps:$4 sm:$0xff]   ;;  %v3054_v33 = vld [vmem:[#allocation8 + $0x68] ss:$16 sps:$4 sm:$0xff]  }
 0x162   :  { %1251 = vmatpush1.bf16.msra.mxu0 %v2973_v34  ;;  %1333 = vmatpush1.bf16.msra.mxu1 %v2976_v35  ;;  %v3059_v34 = vld [vmem:[#allocation8 + $0x84] ss:$16 sps:$4 sm:$0xff]   ;;  %v3062_v35 = vld [vmem:[#allocation8 + $0x8c] ss:$16 sps:$4 sm:$0xff]  }
 0x163   :  { %1252 = vmatprep.subr.bf16.mxu0 %v2981_v36  ;;  %1334 = vmatprep.subr.bf16.mxu1 %v2984_v37  ;;  %v3057_v36 = vld [vmem:[#allocation8 + $0x80] ss:$16 sps:$4 sm:$0xff]   ;;  %v3060_v37 = vld [vmem:[#allocation8 + $0x88] ss:$16 sps:$4 sm:$0xff]  }
 0x166   :  { %1253 = vmatpush1.bf16.msra.mxu0 %v2979_v38  ;;  %1335 = vmatpush1.bf16.msra.mxu1 %v2982_v39  ;;  %v3065_v38 = vld [vmem:[#allocation8 + $0xa4] ss:$16 sps:$4 sm:$0xff]   ;;  %v3068_v39 = vld [vmem:[#allocation8 + $0xac] ss:$16 sps:$4 sm:$0xff]  }
 0x167   :  { %1254 = vmatprep.subr.bf16.mxu0 %v2987_v40  ;;  %1336 = vmatprep.subr.bf16.mxu1 %v2990_v41  ;;  %v3063_v40 = vld [vmem:[#allocation8 + $0xa0] ss:$16 sps:$4 sm:$0xff]   ;;  %v3066_v41 = vld [vmem:[#allocation8 + $0xa8] ss:$16 sps:$4 sm:$0xff]  }
 0x16a   :  { %1255 = vmatpush1.bf16.msra.mxu0 %v2985_v43  ;;  %1337 = vmatpush1.bf16.msra.mxu1 %v2988_v45  ;;  %v3071_v43 = vld [vmem:[#allocation8 + $0xc4] ss:$16 sps:$4 sm:$0xff]   ;;  %v3074_v45 = vld [vmem:[#allocation8 + $0xcc] ss:$16 sps:$4 sm:$0xff]  }
 0x16b   :  { %1256 = vmatprep.subr.bf16.mxu0 %v2993_v47  ;;  %1338 = vmatprep.subr.bf16.mxu1 %v2996_v48  ;;  %v3069_v47 = vld [vmem:[#allocation8 + $0xc0] ss:$16 sps:$4 sm:$0xff]   ;;  %v3072_v48 = vld [vmem:[#allocation8 + $0xc8] ss:$16 sps:$4 sm:$0xff]  }
 0x16e   :  { %1257 = vmatpush1.bf16.msra.mxu0 %v2991_v50  ;;  %1339 = vmatpush1.bf16.msra.mxu1 %v2994_v51  ;;  %v3077_v50 = vld [vmem:[#allocation8 + $0xe4] ss:$16 sps:$4 sm:$0xff]   ;;  %v3080_v51 = vld [vmem:[#allocation8 + $0xec] ss:$16 sps:$4 sm:$0xff]  }
 0x16f   :  { %1258 = vmatprep.subr.bf16.mxu0 %v2999_v52  ;;  %1340 = vmatprep.subr.bf16.mxu1 %v3002_v53  ;;  %v3075_v52 = vld [vmem:[#allocation8 + $0xe0] ss:$16 sps:$4 sm:$0xff]   ;;  %v3078_v53 = vld [vmem:[#allocation8 + $0xe8] ss:$16 sps:$4 sm:$0xff]  }
 0x172   :  { %1259 = vmatpush1.bf16.msra.mxu0 %v2997_v54  ;;  %1341 = vmatpush1.bf16.msra.mxu1 %v3000_v55  ;;  %v3083_v54 = vld [vmem:[#allocation8 + $0x104] ss:$16 sps:$4 sm:$0xff]   ;;  %v3086_v55 = vld [vmem:[#allocation8 + $0x10c] ss:$16 sps:$4 sm:$0xff]  }
 0x173   :  { %1260 = vmatprep.subr.bf16.mxu0 %v3005_v56  ;;  %1342 = vmatprep.subr.bf16.mxu1 %v3008_v57  ;;  %v3081_v56 = vld [vmem:[#allocation8 + $0x100] ss:$16 sps:$4 sm:$0xff]   ;;  %v3084_v57 = vld [vmem:[#allocation8 + $0x108] ss:$16 sps:$4 sm:$0xff]  }
 0x176   :  { %1261 = vmatpush1.bf16.msra.mxu0 %v3003_v58  ;;  %1343 = vmatpush1.bf16.msra.mxu1 %v3006_v59  ;;  %v3089_v58 = vld [vmem:[#allocation8 + $0x124] ss:$16 sps:$4 sm:$0xff]   ;;  %v3092_v59 = vld [vmem:[#allocation8 + $0x12c] ss:$16 sps:$4 sm:$0xff]  }
 0x177   :  { %1262 = vmatprep.subr.bf16.mxu0 %v3011_v60  ;;  %1344 = vmatprep.subr.bf16.mxu1 %v3014_v61  ;;  %v3087_v60 = vld [vmem:[#allocation8 + $0x120] ss:$16 sps:$4 sm:$0xff]   ;;  %v3090_v61 = vld [vmem:[#allocation8 + $0x128] ss:$16 sps:$4 sm:$0xff]  }
 0x17a   :  { %1263 = vmatpush1.bf16.msra.mxu0 %v3009_v62  ;;  %1345 = vmatpush1.bf16.msra.mxu1 %v3012_v63  ;;  %v3095_v62 = vld [vmem:[#allocation8 + $0x144] ss:$16 sps:$4 sm:$0xff]   ;;  %v3098_v63 = vld [vmem:[#allocation8 + $0x14c] ss:$16 sps:$4 sm:$0xff]  }
 0x17b   :  { %1264 = vmatprep.subr.bf16.mxu0 %v3017_v2  ;;  %1346 = vmatprep.subr.bf16.mxu1 %v3020_v3  ;;  %v3096_v2 = vld [vmem:[#allocation8 + $0x148] ss:$16 sps:$4 sm:$0xff]   ;;  %v3101_v3 = vld [vmem:[#allocation8 + $0x164] ss:$16 sps:$4 sm:$0xff]  }
 0x17e   :  { %1265 = vmatpush1.bf16.msra.mxu0 %v3015_v4  ;;  %1347 = vmatpush1.bf16.msra.mxu1 %v3018_v5  ;;  %v3104_v4 = vld [vmem:[#allocation8 + $0x16c] ss:$16 sps:$4 sm:$0xff]   ;;  %v3099_v5 = vld [vmem:[#allocation8 + $0x160] ss:$16 sps:$4 sm:$0xff]  }
 0x17f   :  { %1266 = vmatprep.subr.bf16.mxu0 %v3023_v7  ;;  %1348 = vmatprep.subr.bf16.mxu1 %v3026_v8  ;;  %v3107_v7 = vld [vmem:[#allocation8 + $0x184] ss:$16 sps:$4 sm:$0xff]   ;;  %v3110_v8 = vld [vmem:[#allocation8 + $0x18c] ss:$16 sps:$4 sm:$0xff]  }
 0x182   :  { %1267 = vmatpush1.bf16.msra.mxu0 %v3021_v9  ;;  %1349 = vmatpush1.bf16.msra.mxu1 %v3024_v11  ;;  %v3105_v9 = vld [vmem:[#allocation8 + $0x180] ss:$16 sps:$4 sm:$0xff]   ;;  %v3108_v11 = vld [vmem:[#allocation8 + $0x188] ss:$16 sps:$4 sm:$0xff]  }
 0x183   :  { %1268 = vmatprep.subr.bf16.mxu0 %v3029_v13  ;;  %1350 = vmatprep.subr.bf16.mxu1 %v3032_v14  ;;  %v3111_v13 = vld [vmem:[#allocation8 + $0x1a0] ss:$16 sps:$4 sm:$0xff]   ;;  %v3114_v14 = vld [vmem:[#allocation8 + $0x1a8] ss:$16 sps:$4 sm:$0xff]  }
 0x186   :  { %1269 = vmatpush1.bf16.msra.mxu0 %v3027_v15  ;;  %1351 = vmatpush1.bf16.msra.mxu1 %v3030_v16  ;;  %v3119_v15 = vld [vmem:[#allocation8 + $0x1c4] ss:$16 sps:$4 sm:$0xff]   ;;  %v3122_v16 = vld [vmem:[#allocation8 + $0x1cc] ss:$16 sps:$4 sm:$0xff]  }
 0x187   :  { %2195 = vmatprep.subr.bf16.mxu0 %v3035_v18  ;;  %2277 = vmatprep.subr.bf16.mxu1 %v3038_v19  ;;  %v3120_v18 = vld [vmem:[#allocation8 + $0x1c8] ss:$16 sps:$4 sm:$0xff]   ;;  %v3125_v19 = vld [vmem:[#allocation8 + $0x1e4] ss:$16 sps:$4 sm:$0xff]  }
 0x189   :  { %1271 = vmatmul.mubr.bf16.vlgmr.msra.gmra.mrb[4].mxu0 %v427_v10  ;;  %1353 = vmatmul.mubr.bf16.vlgmr.msra.gmra.mrb[4].mxu1 %v427_v10  ;;  %v3126_v10 = vld [vmem:[#allocation8 + $0x1e8] ss:$16 sps:$4 sm:$0xff]  }
 0x18a   :  { %2196 = vmatpush1.bf16.msra.mxu0 %v3033_v20  ;;  %2278 = vmatpush1.bf16.msra.mxu1 %v3036_v21  ;;  %v3128_v20 = vld [vmem:[#allocation8 + $0x1ec] ss:$16 sps:$4 sm:$0xff]   ;;  %v3123_v21 = vld [vmem:[#allocation8 + $0x1e0] ss:$16 sps:$4 sm:$0xff]  }
 0x18b   :  { %2197 = vmatprep.subr.bf16.mxu0 %v3041_v22  ;;  %2279 = vmatprep.subr.bf16.mxu1 %v3044_v23  ;;  %v3131_v22 = vld [vmem:[#allocation8 + $0x204] ss:$16 sps:$4 sm:$0xff]   ;;  %v3134_v23 = vld [vmem:[#allocation8 + $0x20c] ss:$16 sps:$4 sm:$0xff]  }
 0x18e   :  { %2198 = vmatpush1.bf16.msra.mxu0 %v3039_v24  ;;  %2280 = vmatpush1.bf16.msra.mxu1 %v3042_v25  ;;  %v2638_v24 = vld.sshfl [vmem:[%s3520_s4] sm:$0x33 pattern:$0x75316420] }
 0x18f   :  { %2199 = vmatprep.subr.bf16.mxu0 %v3047_v26  ;;  %2281 = vmatprep.subr.bf16.mxu1 %v3050_v27  ;;  %v1374_v25 = vcombine.high %v2638_v24, %v2638_v24  ;;  %v3475_v27 = vrot.slane %v2638_v24, %v3445_v44  ;;  %v3177_v24 = vld [vmem:[#allocation8 + $0x300] ss:$16 sps:$4 sm:$0xff]  }
 0x191   :  { %v1388_v26 = vrot.slane %v1374_v25, %v3445_v44  ;;  %v3180_v25 = vld [vmem:[#allocation8 + $0x308] ss:$16 sps:$4 sm:$0xff]  }
 0x192   :  { %2200 = vmatpush1.bf16.msra.mxu0 %v3045_v28  ;;  %2282 = vmatpush1.bf16.msra.mxu1 %v3048_v29  ;;  %v1392_v29 = vpack.i.b16 %v3475_v27, %v3475_v27 }
 0x193   :  { %2201 = vmatprep.subr.bf16.mxu0 %v3053_v30  ;;  %2283 = vmatprep.subr.bf16.mxu1 %v3056_v31  ;;  %v1390_v28 = vcombine.high %v1388_v26, %v1388_v26  ;;  %v1399_v30 = vpack.i.b16 %v1388_v26, %v1388_v26  ;;  %v3185_v26 = vld [vmem:[#allocation8 + $0x324] ss:$16 sps:$4 sm:$0xff]  }
 0x195   :  { %v1413_v31 = vpack.i.b16 %v1390_v28, %v1390_v28  ;;  %v3188_v28 = vld [vmem:[#allocation8 + $0x32c] ss:$16 sps:$4 sm:$0xff]  }
 0x196   :  { %2202 = vmatpush1.bf16.msra.mxu0 %v3051_v32  ;;  %2284 = vmatpush1.bf16.msra.mxu1 %v3054_v33  ;;  %v1397_v32 = vrot.slane %v1392_v29, %v3454_v49  ;;  %v3183_v29 = vld [vmem:[#allocation8 + $0x320] ss:$16 sps:$4 sm:$0xff]  }
 0x197   :  { %2203 = vmatprep.subr.bf16.mxu0 %v3059_v34  ;;  %2285 = vmatprep.subr.bf16.mxu1 %v3062_v35  ;;  %v1404_v35 = vrot.slane %v1399_v30, %v3454_v49  ;;  %v3186_v30 = vld [vmem:[#allocation8 + $0x328] ss:$16 sps:$4 sm:$0xff]  }
 0x19a   :  { %2204 = vmatpush1.bf16.msra.mxu0 %v3057_v36  ;;  %2286 = vmatpush1.bf16.msra.mxu1 %v3060_v37 }
 0x19b   :  { %2205 = vmatprep.subr.bf16.mxu0 %v3065_v38  ;;  %2287 = vmatprep.subr.bf16.mxu1 %v3068_v39  ;;  %v1418_v39 = vrot.slane %v1413_v31, %v3454_v49  ;;  %v3191_v31 = vld [vmem:[#allocation8 + $0x344] ss:$16 sps:$4 sm:$0xff]  }
 0x19e   :  { %2206 = vmatpush1.bf16.msra.mxu0 %v3063_v40  ;;  %2288 = vmatpush1.bf16.msra.mxu1 %v3066_v41 }
 0x19f   :  { %2207 = vmatprep.subr.bf16.mxu0 %v3071_v43  ;;  %2289 = vmatprep.subr.bf16.mxu1 %v3074_v45 }
 0x1a2   :  { %2208 = vmatpush1.bf16.msra.mxu0 %v3069_v47  ;;  %2290 = vmatpush1.bf16.msra.mxu1 %v3072_v48 }
 0x1a3   :  { %2209 = vmatprep.subr.bf16.mxu0 %v3077_v50  ;;  %2291 = vmatprep.subr.bf16.mxu1 %v3080_v51 }
 0x1a6   :  { %2210 = vmatpush1.bf16.msra.mxu0 %v3075_v52  ;;  %2292 = vmatpush1.bf16.msra.mxu1 %v3078_v53 }
 0x1a7   :  { %2211 = vmatprep.subr.bf16.mxu0 %v3083_v54  ;;  %2293 = vmatprep.subr.bf16.mxu1 %v3086_v55  ;;  %v3129_v54 = vld [vmem:[#allocation8 + $0x200] ss:$16 sps:$4 sm:$0xff]   ;;  %v3132_v55 = vld [vmem:[#allocation8 + $0x208] ss:$16 sps:$4 sm:$0xff]  }
 0x1aa   :  { %2212 = vmatpush1.bf16.msra.mxu0 %v3081_v56  ;;  %2294 = vmatpush1.bf16.msra.mxu1 %v3084_v57  ;;  %v3137_v57 = vld [vmem:[#allocation8 + $0x224] ss:$16 sps:$4 sm:$0xff]  }
 0x1ab   :  { %2213 = vmatprep.subr.bf16.mxu0 %v3089_v58  ;;  %2295 = vmatprep.subr.bf16.mxu1 %v3092_v59  ;;  %v3140_v58 = vld [vmem:[#allocation8 + $0x22c] ss:$16 sps:$4 sm:$0xff]  }
 0x1ae   :  { %2214 = vmatpush1.bf16.msra.mxu0 %v3087_v60  ;;  %2296 = vmatpush1.bf16.msra.mxu1 %v3090_v61  ;;  %v3135_v60 = vld [vmem:[#allocation8 + $0x220] ss:$16 sps:$4 sm:$0xff]   ;;  %v3138_v61 = vld [vmem:[#allocation8 + $0x228] ss:$16 sps:$4 sm:$0xff]  }
 0x1af   :  { %2215 = vmatprep.subr.bf16.mxu0 %v3095_v62  ;;  %2297 = vmatprep.subr.bf16.mxu1 %v3098_v63  ;;  %v3143_v62 = vld [vmem:[#allocation8 + $0x244] ss:$16 sps:$4 sm:$0xff]   ;;  %v3146_v63 = vld [vmem:[#allocation8 + $0x24c] ss:$16 sps:$4 sm:$0xff]  }
 0x1b2   :  { %2216 = vmatpush1.bf16.msra.mxu0 %v3093_v0  ;;  %2298 = vmatpush1.bf16.msra.mxu1 %v3096_v2  ;;  %v3141_v0 = vld [vmem:[#allocation8 + $0x240] ss:$16 sps:$4 sm:$0xff]   ;;  %v3144_v2 = vld [vmem:[#allocation8 + $0x248] ss:$16 sps:$4 sm:$0xff]  }
 0x1b3   :  { %2217 = vmatprep.subr.bf16.mxu0 %v3101_v3  ;;  %2299 = vmatprep.subr.bf16.mxu1 %v3104_v4  ;;  %v3149_v3 = vld [vmem:[#allocation8 + $0x264] ss:$16 sps:$4 sm:$0xff]   ;;  %v3152_v4 = vld [vmem:[#allocation8 + $0x26c] ss:$16 sps:$4 sm:$0xff]  }
 0x1b6   :  { %2218 = vmatpush1.bf16.msra.mxu0 %v3099_v5  ;;  %2300 = vmatpush1.bf16.msra.mxu1 %v3102_v6  ;;  %v3147_v5 = vld [vmem:[#allocation8 + $0x260] ss:$16 sps:$4 sm:$0xff]   ;;  %v3150_v6 = vld [vmem:[#allocation8 + $0x268] ss:$16 sps:$4 sm:$0xff]  }
 0x1b7   :  { %2219 = vmatprep.subr.bf16.mxu0 %v3107_v7  ;;  %2301 = vmatprep.subr.bf16.mxu1 %v3110_v8  ;;  %v3155_v7 = vld [vmem:[#allocation8 + $0x284] ss:$16 sps:$4 sm:$0xff]   ;;  %v3158_v8 = vld [vmem:[#allocation8 + $0x28c] ss:$16 sps:$4 sm:$0xff]  }
 0x1ba   :  { %2220 = vmatpush1.bf16.msra.mxu0 %v3105_v9  ;;  %2302 = vmatpush1.bf16.msra.mxu1 %v3108_v11  ;;  %v3153_v9 = vld [vmem:[#allocation8 + $0x280] ss:$16 sps:$4 sm:$0xff]   ;;  %v3156_v11 = vld [vmem:[#allocation8 + $0x288] ss:$16 sps:$4 sm:$0xff]  }
 0x1bb   :  { %2221 = vmatprep.subr.bf16.mxu0 %v3113_v12  ;;  %2303 = vmatprep.subr.bf16.mxu1 %v3116_v46  ;;  %v3161_v12 = vld [vmem:[#allocation8 + $0x2a4] ss:$16 sps:$4 sm:$0xff]   ;;  %v3164_v46 = vld [vmem:[#allocation8 + $0x2ac] ss:$16 sps:$4 sm:$0xff]  }
 0x1be   :  { %2222 = vmatpush1.bf16.msra.mxu0 %v3111_v13  ;;  %2304 = vmatpush1.bf16.msra.mxu1 %v3114_v14  ;;  %v3159_v13 = vld [vmem:[#allocation8 + $0x2a0] ss:$16 sps:$4 sm:$0xff]   ;;  %v3162_v14 = vld [vmem:[#allocation8 + $0x2a8] ss:$16 sps:$4 sm:$0xff]  }
 0x1bf   :  { %2223 = vmatprep.subr.bf16.mxu0 %v3119_v15  ;;  %2305 = vmatprep.subr.bf16.mxu1 %v3122_v16  ;;  %v3167_v15 = vld [vmem:[#allocation8 + $0x2c4] ss:$16 sps:$4 sm:$0xff]   ;;  %v3170_v16 = vld [vmem:[#allocation8 + $0x2cc] ss:$16 sps:$4 sm:$0xff]  }
 0x1c2   :  { %2224 = vmatpush1.bf16.msra.mxu0 %v3117_v17  ;;  %2306 = vmatpush1.bf16.msra.mxu1 %v3120_v18  ;;  %v3165_v17 = vld [vmem:[#allocation8 + $0x2c0] ss:$16 sps:$4 sm:$0xff]   ;;  %v3168_v18 = vld [vmem:[#allocation8 + $0x2c8] ss:$16 sps:$4 sm:$0xff]  }
 0x1c3   :  { %2225 = vmatprep.subr.bf16.mxu0 %v3125_v19  ;;  %2307 = vmatprep.subr.bf16.mxu1 %v3128_v20  ;;  %v3173_v19 = vld [vmem:[#allocation8 + $0x2e4] ss:$16 sps:$4 sm:$0xff]   ;;  %v3176_v20 = vld [vmem:[#allocation8 + $0x2ec] ss:$16 sps:$4 sm:$0xff]  }
 0x1c6   :  { %2226 = vmatpush1.bf16.msra.mxu0 %v3123_v21  ;;  %2308 = vmatpush1.bf16.msra.mxu1 %v3126_v10  ;;  %v3171_v21 = vld [vmem:[#allocation8 + $0x2e0] ss:$16 sps:$4 sm:$0xff]   ;;  %v3174_v10 = vld [vmem:[#allocation8 + $0x2e8] ss:$16 sps:$4 sm:$0xff]  }
 0x1c7   :  { %2236 = vmatprep.subr.bf16.mxu0 %v3131_v22  ;;  %2318 = vmatprep.subr.bf16.mxu1 %v3134_v23  ;;  %v3179_v22 = vld [vmem:[#allocation8 + $0x304] ss:$16 sps:$4 sm:$0xff]   ;;  %v3182_v23 = vld [vmem:[#allocation8 + $0x30c] ss:$16 sps:$4 sm:$0xff]  }
 0x25c   :  { %v1272_v33 = vpop.f32.mrb[4].mxu0  ;;  %v3480_v34 = vpop.f32.mrb[4].mxu1 }
 0x25d   :  { %v1361_v36 = vpack.c.bf16 %v1272_v33, %v1272_v33  ;;  %v1274_v37 = vpop.f32.mrb[5].mxu0  ;;  %v1356_v38 = vpop.f32.mrb[5].mxu1  ;;  %v3189_v33 = vld [vmem:[#allocation8 + $0x340] ss:$16 sps:$4 sm:$0xff]  }
 0x25e   :  { %v1362_v40 = vpack.c.bf16 %v1274_v37, %v1274_v37  ;;  %v1364_v41 = vpack.c.bf16 %v1356_v38, %v1356_v38  ;;  %v1276_v43 = vpop.f32.mrb[6].mxu0  ;;  %v1358_v45 = vpop.f32.mrb[6].mxu1  ;;  %v3200_v37 = vld [vmem:[#allocation8 + $0x36c] ss:$16 sps:$4 sm:$0xff]   ;;  %v3195_v38 = vld [vmem:[#allocation8 + $0x360] ss:$16 sps:$4 sm:$0xff]  }
 0x25f   :  { %v1419_v47 = vadd.bf16 %v1397_v32, %v1361_v36  ;;  %v1277_v48 = vpop.f32.mrb[7].mxu0  ;;  %v1359_v50 = vpop.f32.mrb[7].mxu1  ;;  %v3194_v32 = vld [vmem:[#allocation8 + $0x34c] ss:$16 sps:$4 sm:$0xff]   ;;  %v3197_v36 = vld [vmem:[#allocation8 + $0x364] ss:$16 sps:$4 sm:$0xff]  }
 0x260   :  { %v1420_v51 = vadd.bf16 %v1404_v35, %v1362_v40  ;;  %v1422_v52 = vadd.bf16 %v1418_v39, %v1364_v41  ;;  %v3192_v35 = vld [vmem:[#allocation8 + $0x348] ss:$16 sps:$4 sm:$0xff]   ;;  %v3203_v40 = vld [vmem:[#allocation8 + $0x384] ss:$16 sps:$4 sm:$0xff]   ;;  %v3206_v41 = vld [vmem:[#allocation8 + $0x38c] ss:$16 sps:$4 sm:$0xff]  }
 0x261   :  { %v1423_v56 = vmax.bf16 %v3325_v1, %v1419_v47  ;;  %v3198_v39 = vld [vmem:[#allocation8 + $0x368] ss:$16 sps:$4 sm:$0xff]   ;;  %v3201_v43 = vld [vmem:[#allocation8 + $0x380] ss:$16 sps:$4 sm:$0xff]   ;;  %v1389_v47 = vcombine.high %v3475_v27, %v3475_v27  ;;  %v3209_v48 = vld [vmem:[#allocation8 + $0x3a4] ss:$16 sps:$4 sm:$0xff]   ;;  %v1363_v27 = vpack.c.bf16 %v3480_v34, %v3480_v34 }
 0x262   :  { %v1424_v53 = vmax.bf16 %v3325_v1, %v1420_v51  ;;  %v1426_v59 = vmax.bf16 %v3325_v1, %v1422_v52  ;;  %v3204_v45 = vld [vmem:[#allocation8 + $0x388] ss:$16 sps:$4 sm:$0xff]   ;;  %v3212_v50 = vld [vmem:[#allocation8 + $0x3ac] ss:$16 sps:$4 sm:$0xff]   ;;  %v3207_v51 = vld [vmem:[#allocation8 + $0x3a0] ss:$16 sps:$4 sm:$0xff]  }
 0x263   :  { %v3210_v52 = vld [vmem:[#allocation8 + $0x3a8] ss:$16 sps:$4 sm:$0xff]  }
 0x264   :  { %2227 = vmatprep.mubr.bf16.mxu0 %v1424_v53  ;;  %2309 = vmatprep.mubr.bf16.mxu1 %v1424_v53  ;;  %v1406_v53 = vpack.i.b16 %v1389_v47, %v1389_v47  ;;  %v2767_v34 = vld.sshfl [vmem:[%s3522_s6] sm:$0x33 pattern:$0x75316420] }
 0x265   :  { %2228 = vmatmul.mubr.bf16.vlgmr.msra.gmra.mrb[8].mxu0 %v1423_v56  ;;  %2310 = vmatmul.mubr.bf16.vlgmr.msra.gmra.mrb[8].mxu1 %v1423_v56  ;;  %v3213_v56 = vld [vmem:[#allocation8 + $0x3c0] ss:$16 sps:$4 sm:$0xff]  }
 0x266   :  { %2237 = vmatpush1.bf16.msra.mxu0 %v3129_v54  ;;  %2319 = vmatpush1.bf16.msra.mxu1 %v3132_v55  ;;  %v3215_v54 = vld [vmem:[#allocation8 + $0x3c4] ss:$16 sps:$4 sm:$0xff]   ;;  %v3218_v55 = vld [vmem:[#allocation8 + $0x3cc] ss:$16 sps:$4 sm:$0xff]  }
 0x267   :  { %2268 = vmatprep.mubr.bf16.mxu0 %v1426_v59  ;;  %2350 = vmatprep.mubr.bf16.mxu1 %v1426_v59  ;;  %v3221_v59 = vld [vmem:[#allocation8 + $0x3e4] ss:$16 sps:$4 sm:$0xff]  }
 0x268   :  { %2238 = vmatprep.subr.bf16.mxu0 %v3137_v57  ;;  %2320 = vmatprep.subr.bf16.mxu1 %v3140_v58  ;;  %v3216_v57 = vld [vmem:[#allocation8 + $0x3c8] ss:$16 sps:$4 sm:$0xff]   ;;  %v1411_v58 = vrot.slane %v1406_v53, %v3454_v49 }
 0x26a   :  { %2239 = vmatpush1.bf16.msra.mxu0 %v3135_v60  ;;  %2321 = vmatpush1.bf16.msra.mxu1 %v3138_v61  ;;  %v3224_v60 = vld [vmem:[#allocation8 + $0x3ec] ss:$16 sps:$4 sm:$0xff]   ;;  %v3219_v61 = vld [vmem:[#allocation8 + $0x3e0] ss:$16 sps:$4 sm:$0xff]  }
 0x26b   :  { %2240 = vmatprep.subr.bf16.mxu0 %v3143_v62  ;;  %2322 = vmatprep.subr.bf16.mxu1 %v3146_v63  ;;  %v3222_v62 = vld [vmem:[#allocation8 + $0x3e8] ss:$16 sps:$4 sm:$0xff]   ;;  %v1421_v63 = vadd.bf16 %v1411_v58, %v1363_v27 }
 0x26e   :  { %2241 = vmatpush1.bf16.msra.mxu0 %v3141_v0  ;;  %2323 = vmatpush1.bf16.msra.mxu1 %v3144_v2  ;;  %v1425_v0 = vmax.bf16 %v3325_v1, %v1421_v63  ;;  %v2372_v2 = vcombine.high %v2767_v34, %v2767_v34 }
 0x26f   :  { %2242 = vmatprep.subr.bf16.mxu0 %v3149_v3  ;;  %2324 = vmatprep.subr.bf16.mxu1 %v3152_v4  ;;  %v2379_v3 = vrot.slane %v2767_v34, %v3445_v44 }
 0x270   :  { %v2386_v4 = vrot.slane %v2372_v2, %v3445_v44 }
 0x272   :  { %2243 = vmatpush1.bf16.msra.mxu0 %v3147_v5  ;;  %2325 = vmatpush1.bf16.msra.mxu1 %v3150_v6  ;;  %v2387_v5 = vcombine.high %v2379_v3, %v2379_v3  ;;  %v2388_v6 = vcombine.high %v2386_v4, %v2386_v4 }
 0x273   :  { %2244 = vmatprep.subr.bf16.mxu0 %v3155_v7  ;;  %2326 = vmatprep.subr.bf16.mxu1 %v3158_v8  ;;  %v2390_v7 = vpack.i.b16 %v2379_v3, %v2379_v3 }
 0x274   :  { %v2404_v8 = vpack.i.b16 %v2387_v5, %v2387_v5 }
 0x276   :  { %2245 = vmatpush1.bf16.msra.mxu0 %v3153_v9  ;;  %2327 = vmatpush1.bf16.msra.mxu1 %v3156_v11  ;;  %v2397_v9 = vpack.i.b16 %v2386_v4, %v2386_v4  ;;  %v2411_v11 = vpack.i.b16 %v2388_v6, %v2388_v6 }
 0x277   :  { %2246 = vmatprep.subr.bf16.mxu0 %v3161_v12  ;;  %2328 = vmatprep.subr.bf16.mxu1 %v3164_v46  ;;  %v2395_v12 = vrot.slane %v2390_v7, %v3454_v49  ;;  %v2409_v46 = vrot.slane %v2404_v8, %v3454_v49 }
 0x27a   :  { %2247 = vmatpush1.bf16.msra.mxu0 %v3159_v13  ;;  %2329 = vmatpush1.bf16.msra.mxu1 %v3162_v14 }
 0x27b   :  { %2248 = vmatprep.subr.bf16.mxu0 %v3167_v15  ;;  %2330 = vmatprep.subr.bf16.mxu1 %v3170_v16  ;;  %v2402_v15 = vrot.slane %v2397_v9, %v3454_v49  ;;  %v2416_v16 = vrot.slane %v2411_v11, %v3454_v49 }
 0x27e   :  { %2249 = vmatpush1.bf16.msra.mxu0 %v3165_v17  ;;  %2331 = vmatpush1.bf16.msra.mxu1 %v3168_v18 }
 0x27f   :  { %2250 = vmatprep.subr.bf16.mxu0 %v3173_v19  ;;  %2332 = vmatprep.subr.bf16.mxu1 %v3176_v20 }
 0x282   :  { %2251 = vmatpush1.bf16.msra.mxu0 %v3171_v21  ;;  %2333 = vmatpush1.bf16.msra.mxu1 %v3174_v10 }
 0x283   :  { %2252 = vmatprep.subr.bf16.mxu0 %v3179_v22  ;;  %2334 = vmatprep.subr.bf16.mxu1 %v3182_v23  ;;  %v2425_v23 = vld [vmem:[%s3523_s7] sm:$0xf] }
 0x286   :  { %2253 = vmatpush1.bf16.msra.mxu0 %v3177_v24  ;;  %2335 = vmatpush1.bf16.msra.mxu1 %v3180_v25  ;;  %v2437_v24 = vsub.s32 1, %v3439_v42 }
 0x287   :  { %2254 = vmatprep.subr.bf16.mxu0 %v3185_v26  ;;  %2336 = vmatprep.subr.bf16.mxu1 %v3188_v28 }
 0x28a   :  { %2255 = vmatpush1.bf16.msra.mxu0 %v3183_v29  ;;  %2337 = vmatpush1.bf16.msra.mxu1 %v3186_v30 }
 0x28b   :  { %2256 = vmatprep.subr.bf16.mxu0 %v3191_v31  ;;  %2338 = vmatprep.subr.bf16.mxu1 %v3194_v32  ;;  %v2441_v32 = vsub.s32 2, %v3439_v42 }
 0x28d   :  { %v2442_v47 = vrot.slane %v2425_v23, %v2441_v32 }
 0x28e   :  { %2257 = vmatpush1.bf16.msra.mxu0 %v3189_v33  ;;  %2339 = vmatpush1.bf16.msra.mxu1 %v3192_v35 }
 0x28f   :  { %2258 = vmatprep.subr.bf16.mxu0 %v3197_v36  ;;  %2340 = vmatprep.subr.bf16.mxu1 %v3200_v37  ;;  %v2434_v36 = vrot.slane %v2425_v23, %v3454_v49 }
 0x292   :  { %2259 = vmatpush1.bf16.msra.mxu0 %v3195_v38  ;;  %2341 = vmatpush1.bf16.msra.mxu1 %v3198_v39  ;;  %v2438_v39 = vrot.slane %v2425_v23, %v2437_v24 }
 0x293   :  { %2260 = vmatprep.subr.bf16.mxu0 %v3203_v40  ;;  %2342 = vmatprep.subr.bf16.mxu1 %v3206_v41  ;;  %v2445_v40 = vsub.s32 3, %v3439_v42 }
 0x296   :  { %2261 = vmatpush1.bf16.msra.mxu0 %v3201_v43  ;;  %2343 = vmatpush1.bf16.msra.mxu1 %v3204_v45 }
 0x297   :  { %2262 = vmatprep.subr.bf16.mxu0 %v3209_v48  ;;  %2344 = vmatprep.subr.bf16.mxu1 %v3212_v50 }
 0x29a   :  { %2263 = vmatpush1.bf16.msra.mxu0 %v3207_v51  ;;  %2345 = vmatpush1.bf16.msra.mxu1 %v3210_v52  ;;  %v2446_v51 = vrot.slane %v2425_v23, %v2445_v40 }
 0x29b   :  { %2264 = vmatprep.subr.bf16.mxu0 %v3215_v54  ;;  %2346 = vmatprep.subr.bf16.mxu1 %v3218_v55 }
 0x29e   :  { %2265 = vmatpush1.bf16.msra.mxu0 %v3213_v56  ;;  %2347 = vmatpush1.bf16.msra.mxu1 %v3216_v57  ;;  %v2768_v57 = vld [vmem:[#allocation2] ss:$0 sm:$0xff] }
 0x29f   :  { %2266 = vmatprep.subr.bf16.mxu0 %v3221_v59  ;;  %2348 = vmatprep.subr.bf16.mxu1 %v3224_v60 }
 0x2a2   :  { %2267 = vmatpush1.bf16.msra.mxu0 %v3219_v61  ;;  %2349 = vmatpush1.bf16.msra.mxu1 %v3222_v62 }
 0x2a5   :  { %2269 = vmatmul.mubr.bf16.vlgmr.msra.gmra.mrb[8].mxu0 %v1425_v0  ;;  %2351 = vmatmul.mubr.bf16.vlgmr.msra.gmra.mrb[8].mxu1 %v1425_v0 }
 0x378   :  { %v2270_v13 = vpop.f32.mrb[8].mxu0  ;;  %v2352_v14 = vpop.f32.mrb[8].mxu1 }
 0x379   :  { %v2359_v17 = vpack.c.bf16 %v2270_v13, %v2270_v13  ;;  %v2361_v18 = vpack.c.bf16 %v2352_v14, %v2352_v14  ;;  %v2272_v19 = vpop.f32.mrb[9].mxu0  ;;  %v2354_v44 = vpop.f32.mrb[9].mxu1 }
 0x37a   :  { %v2360_v20 = vpack.c.bf16 %v2272_v19, %v2272_v19  ;;  %v2362_v21 = vpack.c.bf16 %v2354_v44, %v2354_v44  ;;  %v2274_v10 = vpop.f32.mrb[10].mxu0  ;;  %v2356_v22 = vpop.f32.mrb[10].mxu1 }
 0x37b   :  { %v2417_v25 = vadd.bf16 %v2395_v12, %v2359_v17  ;;  %v2419_v26 = vadd.bf16 %v2409_v46, %v2361_v18  ;;  %v2275_v28 = vpop.f32.mrb[11].mxu0  ;;  %v2357_v29 = vpop.f32.mrb[11].mxu1 }
 0x37c   :  { %v2418_v30 = vadd.bf16 %v2402_v15, %v2360_v20  ;;  %v2420_v31 = vadd.bf16 %v2416_v16, %v2362_v21 }
 0x37d   :  { %v2421_v33 = vmax.bf16 %v3325_v1, %v2417_v25  ;;  %v2423_v35 = vmax.bf16 %v3325_v1, %v2419_v26 }
 0x37e   :  { %v2422_v37 = vmax.bf16 %v3325_v1, %v2418_v30  ;;  %v2424_v38 = vmax.bf16 %v3325_v1, %v2420_v31 }
 0x37f   :  { %v2426_v41 = vunpack.c.l.bf16 %v2421_v33  ;;  %v2428_v43 = vunpack.c.l.bf16 %v2423_v35 }
 0x380   :  { %v2427_v45 = vunpack.c.l.bf16 %v2422_v37  ;;  %v2429_v50 = vunpack.c.l.bf16 %v2424_v38 }
 0x381   :  { %v2451_v48 = vmul.f32 %v2434_v36, %v2426_v41  ;;  %v2453_v53 = vmul.f32 %v2442_v47, %v2428_v43 }
 0x382   :  { %v2452_v52 = vmul.f32 %v2438_v39, %v2427_v45  ;;  %v2454_v55 = vmul.f32 %v2446_v51, %v2429_v50 }
 0x384   :  { %v2455_v54 = vadd.f32 %v2452_v52, %v2451_v48 }
 0x386   :  { %v2456_v56 = vadd.f32 %v2455_v54, %v2453_v53 }
 0x388   :  { %v2457_v49 = vadd.f32 %v2456_v56, %v2454_v55 }
 0x38a   :  { %2458 = vadd.xlane.f32.xlu0 %v2457_v49 }
 0x417   :  { %v2459_v27 = vpop.xlane.xlu0 %2458 }
 0x418   :  { %v2467_v1 = vadd.f32 %v2768_v57, %v2459_v27 }
 0x41a   :  { %2469 = vst.msk [vmem:[%s3525_s9] sm:$0xff] %vm2468_vm0, %v2467_v1 }
 0x41b   :  { %2474 = vsyncpa [#allocation4], 1 }
 0x41c   :  { %2475 = vsyncpa [#allocation6], 1 }
 0x41d   :  { %2476 = vsyncpa [#allocation9], 1 }

</bundles_post_ra>
